<compile_context>
chip_gen: v5e
topology: v5e:2x2
jax: 0.10.0
libtpu: 0.0.40
codegen_flags: <defaults>
</compile_context>

<pallas_src>
import math
import jax
import jax.numpy as jnp
from jax.experimental import pallas as pl
from jax.experimental.pallas import tpu as pltpu

# module-consistent small shapes
B = 2           # batch
S = 8           # source sequence length
H = 32          # hid_dim
NH = 4          # n_heads
HD = H // NH    # head_dim
PF = 64         # pf_dim
L = 2           # n_layers
VOCAB = 32      # input_dim (vocab)
MAX_LEN = 16    # max_length of the positional table (>= S)

SCALE = math.sqrt(HD)      # attention scale (folded into wq / bq host-side)
EMB_SCALE = math.sqrt(H)   # embedding scale (folded into the token table host-side)
EPS = 1e-5                 # nn.LayerNorm default
NEG = -1e10                # masked_fill value


def _layer_norm(x, g, b):
    mu = jnp.mean(x, axis=-1, keepdims=True)
    var = jnp.mean((x - mu) ** 2, axis=-1, keepdims=True)
    return (x - mu) * jax.lax.rsqrt(var + EPS) * g + b


def encoder_kernel(ids_ref, mask_ref, emb_ref, wattn_ref, bqkv_ref,
                   wffn_ref, vec_ref, out_ref):
    # per-batch inputs
    ids = ids_ref[0]                 # [S, 1] int32 token ids
    mask_add = mask_ref[0]           # [1, S]  additive mask: 0 (valid) / -1e10 (pad)

    # ---- embeddings: gather via one-hot matmul (token table pre-scaled by sqrt(H)) ----
    onehot = (jax.lax.broadcasted_iota(jnp.int32, (S, VOCAB), 1) == ids
              ).astype(jnp.float32)                                   # [S, VOCAB]
    tok_tab = emb_ref[0:VOCAB, :]                                     # [VOCAB, H]
    pos_tab = emb_ref[VOCAB:VOCAB + S, :]                             # [S, H]
    x = jnp.dot(onehot, tok_tab, preferred_element_type=jnp.float32) + pos_tab
    # TODO(synk): dropout is treated as identity (inference); training-mode dropout would
    # need pltpu.prng_seed / pltpu.prng_random_bits.

    for l in range(L):   # static unroll over encoder layers (L is small)
        # ---- packed parameter views for this layer (all static slices) ----
        wq = wattn_ref[(l * 4 + 0) * NH:(l * 4 + 1) * NH, :, :]   # [NH, H, HD] (pre-scaled)
        wk = wattn_ref[(l * 4 + 1) * NH:(l * 4 + 2) * NH, :, :]   # [NH, H, HD]
        wv = wattn_ref[(l * 4 + 2) * NH:(l * 4 + 3) * NH, :, :]   # [NH, H, HD]
        wot = wattn_ref[(l * 4 + 3) * NH:(l * 4 + 4) * NH, :, :]  # [NH, H, HD] = per-head wo^T
        bq = bqkv_ref[(l * 3 + 0) * NH:(l * 3 + 1) * NH, :, :]    # [NH, 1, HD] (pre-scaled)
        bk = bqkv_ref[(l * 3 + 1) * NH:(l * 3 + 2) * NH, :, :]
        bv = bqkv_ref[(l * 3 + 2) * NH:(l * 3 + 3) * NH, :, :]
        wf1 = wffn_ref[l * 2 + 0]                                 # [H, PF]
        wf2t = wffn_ref[l * 2 + 1]                                # [H, PF] = wf2^T
        bo  = vec_ref[l * 7 + 0:l * 7 + 1, 0:H]                   # [1, H]
        g1  = vec_ref[l * 7 + 1:l * 7 + 2, 0:H]
        be1 = vec_ref[l * 7 + 2:l * 7 + 3, 0:H]
        g2  = vec_ref[l * 7 + 3:l * 7 + 4, 0:H]
        be2 = vec_ref[l * 7 + 4:l * 7 + 5, 0:H]
        bf2 = vec_ref[l * 7 + 5:l * 7 + 6, 0:H]
        bf1 = vec_ref[l * 7 + 6:l * 7 + 7, :]                     # [1, PF]

        # ---- self attention: all heads batched in single dot_generals (no .T / concat) ----
        xb = jnp.broadcast_to(x[None], (NH, S, H))                # [NH, S, H]
        q = jnp.einsum('hsk,hkd->hsd', xb, wq,
                       preferred_element_type=jnp.float32) + bq   # [NH, S, HD]
        k = jnp.einsum('hsk,hkd->hsd', xb, wk,
                       preferred_element_type=jnp.float32) + bk
        v = jnp.einsum('hsk,hkd->hsd', xb, wv,
                       preferred_element_type=jnp.float32) + bv
        e = jnp.einsum('hqd,hkd->hqk', q, k,
                       preferred_element_type=jnp.float32) + mask_add      # [NH, S, S]
        a = jax.nn.softmax(e, axis=-1)
        ctx = jnp.einsum('hqk,hkd->hqd', a, v,
                         preferred_element_type=jnp.float32)               # [NH, S, HD]
        sa = jnp.einsum('hqd,hed->hqe', ctx, wot,
                        preferred_element_type=jnp.float32).sum(axis=0) + bo  # [S, H]
        x = _layer_norm(x + sa, g1, be1)

        # ---- position-wise feed-forward ----
        hdn = jnp.maximum(
            jnp.dot(x, wf1, preferred_element_type=jnp.float32) + bf1, 0.0)   # [S, PF]
        ff = jax.lax.dot_general(hdn, wf2t, (((1,), (1,)), ((), ())),
                                 preferred_element_type=jnp.float32) + bf2    # [S, H]
        x = _layer_norm(x + ff, g2, be2)

    # one whole-tile store per grid step; [S, H] per batch is a single contiguous 1 KiB
    # HBM writeback, so an in-kernel (8,32)->(1,256) relayout for a lane-dense slab would
    # cost more than the masked store it removes at these shapes.
    out_ref[0] = x


def pack_params(params):
    """Pack all encoder parameters into 5 slabs so the kernel needs only a few DMAs."""
    inv_scale = 1.0 / SCALE
    w_rows, b_rows, ff_rows, vec_rows = [], [], [], []

    def pad_h(vv):
        return jnp.pad(vv, (0, PF - H))

    for lp in params['layers']:
        # head-major projection weights [NH, H, HD]; 1/sqrt(head_dim) folded into q.
        wq = (lp['wq'] * inv_scale).reshape(H, NH, HD).transpose(1, 0, 2)
        wk = lp['wk'].reshape(H, NH, HD).transpose(1, 0, 2)
        wv = lp['wv'].reshape(H, NH, HD).transpose(1, 0, 2)
        wot = lp['wo'].reshape(NH, HD, H).transpose(0, 2, 1)      # per-head wo^T -> [NH, H, HD]
        w_rows += [wq, wk, wv, wot]
        b_rows += [(lp['bq'] * inv_scale).reshape(NH, 1, HD),
                   lp['bk'].reshape(NH, 1, HD),
                   lp['bv'].reshape(NH, 1, HD)]
        ff_rows += [lp['wf1'][None], lp['wf2'].T[None]]           # each [1, H, PF]
        vec_rows += [pad_h(lp['bo']), pad_h(lp['g1']), pad_h(lp['be1']),
                     pad_h(lp['g2']), pad_h(lp['be2']), pad_h(lp['bf2']), lp['bf1']]

    emb = jnp.concatenate([params['tok_emb'] * EMB_SCALE,
                           params['pos_emb'][:S]], axis=0)        # [VOCAB+S, H]
    w_attn = jnp.concatenate(w_rows, axis=0)                      # [L*4*NH, H, HD]
    b_qkv = jnp.concatenate(b_rows, axis=0)                       # [L*3*NH, 1, HD]
    w_ffn = jnp.concatenate(ff_rows, axis=0)                      # [L*2,    H, PF]
    vec = jnp.stack(vec_rows, axis=0)                             # [L*7,    PF]
    return emb, w_attn, b_qkv, w_ffn, vec


def encoder_forward(src_ids, src_mask, params):
    emb, w_attn, b_qkv, w_ffn, vec = pack_params(params)
    ids3d = src_ids.astype(jnp.int32).reshape(B, S, 1)
    mask_add = (NEG * (1.0 - src_mask.astype(jnp.float32))).reshape(B, 1, S)

    in_specs = [
        pl.BlockSpec((1, S, 1), lambda b: (b, 0, 0)),             # token ids (per batch)
        pl.BlockSpec((1, 1, S), lambda b: (b, 0, 0)),             # additive mask (per batch)
        pl.BlockSpec((VOCAB + S, H), lambda b: (0, 0)),           # packed embedding tables
        pl.BlockSpec((L * 4 * NH, H, HD), lambda b: (0, 0, 0)),   # packed attention weights
        pl.BlockSpec((L * 3 * NH, 1, HD), lambda b: (0, 0, 0)),   # packed q/k/v biases
        pl.BlockSpec((L * 2, H, PF), lambda b: (0, 0, 0)),        # packed FFN weights
        pl.BlockSpec((L * 7, PF), lambda b: (0, 0)),              # packed biases / LN params
    ]
    out_spec = pl.BlockSpec((1, S, H), lambda b: (b, 0, 0))

    return pl.pallas_call(
        encoder_kernel,
        out_shape=jax.ShapeDtypeStruct((B, S, H), jnp.float32),
        grid_spec=pltpu.PrefetchScalarGridSpec(
            num_scalar_prefetch=0,
            grid=(B,),
            in_specs=in_specs,
            out_specs=out_spec,
        ),
        compiler_params=pltpu.CompilerParams(
            # batch items are fully independent -> lets v7x use both TensorCores
            dimension_semantics=("parallel",)),
    )(ids3d, mask_add, emb, w_attn, b_qkv, w_ffn, vec)


def init_params(key):
    keys = jax.random.split(key, 2 + L * 16)
    ki = iter(keys)

    def mat(shape, scale=0.1):
        return (scale * jax.random.normal(next(ki), shape)).astype(jnp.float32)

    params = {'tok_emb': mat((VOCAB, H)), 'pos_emb': mat((MAX_LEN, H)), 'layers': []}
    for _ in range(L):
        lp = {}
        for nm in ('q', 'k', 'v', 'o'):
            lp[f'w{nm}'] = mat((H, H))
            lp[f'b{nm}'] = mat((H,))
        lp['g1'] = (1.0 + mat((H,))).astype(jnp.float32)
        lp['be1'] = mat((H,))
        lp['g2'] = (1.0 + mat((H,))).astype(jnp.float32)
        lp['be2'] = mat((H,))
        lp['wf1'] = mat((H, PF))
        lp['bf1'] = mat((PF,))
        lp['wf2'] = mat((PF, H))
        lp['bf2'] = mat((H,))
        params['layers'].append(lp)
    return params


def reference(src_ids, src_mask, params):
    def ln(x, g, b):
        mu = x.mean(-1, keepdims=True)
        var = ((x - mu) ** 2).mean(-1, keepdims=True)
        return (x - mu) / jnp.sqrt(var + EPS) * g + b

    x = params['tok_emb'][src_ids] * EMB_SCALE + params['pos_emb'][:S][None]
    for lp in params['layers']:
        Q = x @ lp['wq'] + lp['bq']
        K = x @ lp['wk'] + lp['bk']
        V = x @ lp['wv'] + lp['bv']
        Qh = Q.reshape(B, S, NH, HD).transpose(0, 2, 1, 3)
        Kh = K.reshape(B, S, NH, HD).transpose(0, 2, 1, 3)
        Vh = V.reshape(B, S, NH, HD).transpose(0, 2, 1, 3)
        e = jnp.einsum('bhqd,bhkd->bhqk', Qh, Kh) / SCALE
        e = jnp.where(src_mask == 0, NEG, e)
        a = jax.nn.softmax(e, axis=-1)
        ctx = jnp.einsum('bhqk,bhkd->bhqd', a, Vh).transpose(0, 2, 1, 3).reshape(B, S, H)
        sa = ctx @ lp['wo'] + lp['bo']
        x = ln(x + sa, lp['g1'], lp['be1'])
        ff = jnp.maximum(x @ lp['wf1'] + lp['bf1'], 0.0) @ lp['wf2'] + lp['bf2']
        x = ln(x + ff, lp['g2'], lp['be2'])
    return x


if __name__ == "__main__":
    key = jax.random.PRNGKey(0)
    k_ids, k_par = jax.random.split(key)

    src_ids = jax.random.randint(k_ids, (B, S), 0, VOCAB)

    # padding mask [B, 1, 1, S]: batch 0 fully valid, batch 1 has 2 padded positions
    src_valid = jnp.stack([
        jnp.ones((S,), jnp.float32),
        jnp.concatenate([jnp.ones((S - 2,), jnp.float32), jnp.zeros((2,), jnp.float32)]),
    ])
    src_mask = src_valid[:, None, None, :]

    params = init_params(k_par)

    out = encoder_forward(src_ids, src_mask, params)
    jax.block_until_ready(out)

    ref = reference(src_ids, src_mask, params)
    assert out.shape == (B, S, H)
    assert jnp.allclose(out, ref, atol=2e-3, rtol=2e-3), "output mismatch"
    print("KERNEL_OK")
</pallas_src>

<mosaic_0001>
module attributes {stable_mosaic.version = 11 : i64} {
  func.func @encoder_kernel(%arg0: i32, %arg1: memref<1x8x1xi32, #tpu.memory_space<vmem>>, %arg2: memref<1x1x8xf32, #tpu.memory_space<vmem>>, %arg3: memref<40x32xf32, #tpu.memory_space<vmem>>, %arg4: memref<32x32x8xf32, #tpu.memory_space<vmem>>, %arg5: memref<24x1x8xf32, #tpu.memory_space<vmem>>, %arg6: memref<4x32x64xf32, #tpu.memory_space<vmem>>, %arg7: memref<14x64xf32, #tpu.memory_space<vmem>>, %arg8: memref<1x8x32xf32, #tpu.memory_space<vmem>>) attributes {dimension_semantics = [#tpu.dimension_semantics<parallel>], iteration_bounds = array<i64: 2>, scalar_prefetch = 0 : i64, scratch_operands = 0 : i64, tpu.core_type = #tpu.core_type<tc>, window_params = [{transform_indices = @transform_0, window_bounds = array<i64: 1, 8, 1>}, {transform_indices = @transform_1, window_bounds = array<i64: 1, 1, 8>}, {pipeline_mode = #tpu.pipeline_mode<synchronous>, transform_indices = @transform_2, window_bounds = array<i64: 40, 32>}, {pipeline_mode = #tpu.pipeline_mode<synchronous>, transform_indices = @transform_3, window_bounds = array<i64: 32, 32, 8>}, {pipeline_mode = #tpu.pipeline_mode<synchronous>, transform_indices = @transform_4, window_bounds = array<i64: 24, 1, 8>}, {pipeline_mode = #tpu.pipeline_mode<synchronous>, transform_indices = @transform_5, window_bounds = array<i64: 4, 32, 64>}, {pipeline_mode = #tpu.pipeline_mode<synchronous>, transform_indices = @transform_6, window_bounds = array<i64: 14, 64>}, {transform_indices = @transform_7, window_bounds = array<i64: 1, 8, 32>}]} {
    %c0 = arith.constant 0 : index
    %c0_0 = arith.constant 0 : index
    %c0_1 = arith.constant 0 : index
    %0 = vector.load %arg1[%c0, %c0_0, %c0_1] : memref<1x8x1xi32, #tpu.memory_space<vmem>>, vector<1x8x1xi32>
    %1 = vector.shape_cast %0 : vector<1x8x1xi32> to vector<8x1xi32>
    %c0_2 = arith.constant 0 : index
    %c0_3 = arith.constant 0 : index
    %c0_4 = arith.constant 0 : index
    %2 = vector.load %arg2[%c0_2, %c0_3, %c0_4] : memref<1x1x8xf32, #tpu.memory_space<vmem>>, vector<1x1x8xf32>
    %3 = vector.shape_cast %2 : vector<1x1x8xf32> to vector<1x8xf32>
    %4 = tpu.iota {dimensions = array<i32: 1>} : vector<8x32xi32>
    %5 = vector.broadcast %1 : vector<8x1xi32> to vector<8x32xi32>
    %6 = arith.cmpi eq, %4, %5 : vector<8x32xi32>
    %7 = arith.extui %6 : vector<8x32xi1> to vector<8x32xi32>
    %8 = arith.sitofp %7 : vector<8x32xi32> to vector<8x32xf32>
    %c0_5 = arith.constant 0 : index
    %c0_6 = arith.constant 0 : index
    %9 = vector.load %arg3[%c0_5, %c0_6] : memref<40x32xf32, #tpu.memory_space<vmem>>, vector<32x32xf32>
    %c32 = arith.constant 32 : index
    %c0_7 = arith.constant 0 : index
    %10 = vector.load %arg3[%c32, %c0_7] : memref<40x32xf32, #tpu.memory_space<vmem>>, vector<8x32xf32>
    %cst = arith.constant dense<0.000000e+00> : vector<8x32xf32>
    %11 = tpu.matmul %8, %9, %cst {dimension_numbers = #tpu.dot_dimension_numbers<[1], [0], [0], [1], [0, 0, 1, 1], [], []>} : vector<8x32xf32>, vector<32x32xf32>, vector<8x32xf32> -> vector<8x32xf32>
    %12 = arith.addf %11, %10 : vector<8x32xf32>
    %c0_8 = arith.constant 0 : index
    %c0_9 = arith.constant 0 : index
    %c0_10 = arith.constant 0 : index
    %13 = vector.load %arg4[%c0_8, %c0_9, %c0_10] : memref<32x32x8xf32, #tpu.memory_space<vmem>>, vector<4x32x8xf32>
    %c4 = arith.constant 4 : index
    %c0_11 = arith.constant 0 : index
    %c0_12 = arith.constant 0 : index
    %14 = vector.load %arg4[%c4, %c0_11, %c0_12] : memref<32x32x8xf32, #tpu.memory_space<vmem>>, vector<4x32x8xf32>
    %c8 = arith.constant 8 : index
    %c0_13 = arith.constant 0 : index
    %c0_14 = arith.constant 0 : index
    %15 = vector.load %arg4[%c8, %c0_13, %c0_14] : memref<32x32x8xf32, #tpu.memory_space<vmem>>, vector<4x32x8xf32>
    %c12 = arith.constant 12 : index
    %c0_15 = arith.constant 0 : index
    %c0_16 = arith.constant 0 : index
    %16 = vector.load %arg4[%c12, %c0_15, %c0_16] : memref<32x32x8xf32, #tpu.memory_space<vmem>>, vector<4x32x8xf32>
    %c0_17 = arith.constant 0 : index
    %c0_18 = arith.constant 0 : index
    %c0_19 = arith.constant 0 : index
    %17 = vector.load %arg5[%c0_17, %c0_18, %c0_19] : memref<24x1x8xf32, #tpu.memory_space<vmem>>, vector<4x1x8xf32>
    %c4_20 = arith.constant 4 : index
    %c0_21 = arith.constant 0 : index
    %c0_22 = arith.constant 0 : index
    %18 = vector.load %arg5[%c4_20, %c0_21, %c0_22] : memref<24x1x8xf32, #tpu.memory_space<vmem>>, vector<4x1x8xf32>
    %c8_23 = arith.constant 8 : index
    %c0_24 = arith.constant 0 : index
    %c0_25 = arith.constant 0 : index
    %19 = vector.load %arg5[%c8_23, %c0_24, %c0_25] : memref<24x1x8xf32, #tpu.memory_space<vmem>>, vector<4x1x8xf32>
    %c0_26 = arith.constant 0 : index
    %c0_27 = arith.constant 0 : index
    %c0_28 = arith.constant 0 : index
    %20 = vector.load %arg6[%c0_26, %c0_27, %c0_28] : memref<4x32x64xf32, #tpu.memory_space<vmem>>, vector<1x32x64xf32>
    %21 = vector.shape_cast %20 : vector<1x32x64xf32> to vector<32x64xf32>
    %c1 = arith.constant 1 : index
    %c0_29 = arith.constant 0 : index
    %c0_30 = arith.constant 0 : index
    %22 = vector.load %arg6[%c1, %c0_29, %c0_30] : memref<4x32x64xf32, #tpu.memory_space<vmem>>, vector<1x32x64xf32>
    %23 = vector.shape_cast %22 : vector<1x32x64xf32> to vector<32x64xf32>
    %c0_31 = arith.constant 0 : index
    %c0_32 = arith.constant 0 : index
    %24 = vector.load %arg7[%c0_31, %c0_32] : memref<14x64xf32, #tpu.memory_space<vmem>>, vector<1x32xf32>
    %c1_33 = arith.constant 1 : index
    %c0_34 = arith.constant 0 : index
    %25 = vector.load %arg7[%c1_33, %c0_34] : memref<14x64xf32, #tpu.memory_space<vmem>>, vector<1x32xf32>
    %c2 = arith.constant 2 : index
    %c0_35 = arith.constant 0 : index
    %26 = vector.load %arg7[%c2, %c0_35] : memref<14x64xf32, #tpu.memory_space<vmem>>, vector<1x32xf32>
    %c3 = arith.constant 3 : index
    %c0_36 = arith.constant 0 : index
    %27 = vector.load %arg7[%c3, %c0_36] : memref<14x64xf32, #tpu.memory_space<vmem>>, vector<1x32xf32>
    %c4_37 = arith.constant 4 : index
    %c0_38 = arith.constant 0 : index
    %28 = vector.load %arg7[%c4_37, %c0_38] : memref<14x64xf32, #tpu.memory_space<vmem>>, vector<1x32xf32>
    %c5 = arith.constant 5 : index
    %c0_39 = arith.constant 0 : index
    %29 = vector.load %arg7[%c5, %c0_39] : memref<14x64xf32, #tpu.memory_space<vmem>>, vector<1x32xf32>
    %c6 = arith.constant 6 : index
    %c0_40 = arith.constant 0 : index
    %30 = vector.load %arg7[%c6, %c0_40] : memref<14x64xf32, #tpu.memory_space<vmem>>, vector<1x64xf32>
    %31 = vector.shape_cast %12 : vector<8x32xf32> to vector<1x8x32xf32>
    %32 = vector.shape_cast %31 : vector<1x8x32xf32> to vector<1x8x32xf32>
    %33 = vector.broadcast %32 : vector<1x8x32xf32> to vector<4x8x32xf32>
    "tpu.trace_start"() <{level = 10 : i32, message = "hsk,hkd->hsd"}> : () -> ()
    %cst_41 = arith.constant dense<0.000000e+00> : vector<4x8x8xf32>
    %34 = tpu.matmul %33, %13, %cst_41 {dimension_numbers = #tpu.dot_dimension_numbers<[2], [1], [1], [2], [0, 0, 0, 1, 1, 2], [0], [0]>} : vector<4x8x32xf32>, vector<4x32x8xf32>, vector<4x8x8xf32> -> vector<4x8x8xf32>
    "tpu.trace_stop"() : () -> ()
    %35 = vector.broadcast %17 : vector<4x1x8xf32> to vector<4x8x8xf32>
    %36 = arith.addf %34, %35 : vector<4x8x8xf32>
    "tpu.trace_start"() <{level = 10 : i32, message = "hsk,hkd->hsd"}> : () -> ()
    %cst_42 = arith.constant dense<0.000000e+00> : vector<4x8x8xf32>
    %37 = tpu.matmul %33, %14, %cst_42 {dimension_numbers = #tpu.dot_dimension_numbers<[2], [1], [1], [2], [0, 0, 0, 1, 1, 2], [0], [0]>} : vector<4x8x32xf32>, vector<4x32x8xf32>, vector<4x8x8xf32> -> vector<4x8x8xf32>
    "tpu.trace_stop"() : () -> ()
    %38 = vector.broadcast %18 : vector<4x1x8xf32> to vector<4x8x8xf32>
    %39 = arith.addf %37, %38 : vector<4x8x8xf32>
    "tpu.trace_start"() <{level = 10 : i32, message = "hsk,hkd->hsd"}> : () -> ()
    %cst_43 = arith.constant dense<0.000000e+00> : vector<4x8x8xf32>
    %40 = tpu.matmul %33, %15, %cst_43 {dimension_numbers = #tpu.dot_dimension_numbers<[2], [1], [1], [2], [0, 0, 0, 1, 1, 2], [0], [0]>} : vector<4x8x32xf32>, vector<4x32x8xf32>, vector<4x8x8xf32> -> vector<4x8x8xf32>
    "tpu.trace_stop"() : () -> ()
    %41 = vector.broadcast %19 : vector<4x1x8xf32> to vector<4x8x8xf32>
    %42 = arith.addf %40, %41 : vector<4x8x8xf32>
    "tpu.trace_start"() <{level = 10 : i32, message = "hqd,hkd->hqk"}> : () -> ()
    %cst_44 = arith.constant dense<0.000000e+00> : vector<4x8x8xf32>
    %43 = tpu.matmul %36, %39, %cst_44 {dimension_numbers = #tpu.dot_dimension_numbers<[2], [2], [1], [1], [0, 0, 0, 1, 1, 1], [0], [0]>} : vector<4x8x8xf32>, vector<4x8x8xf32>, vector<4x8x8xf32> -> vector<4x8x8xf32>
    "tpu.trace_stop"() : () -> ()
    %44 = vector.shape_cast %3 : vector<1x8xf32> to vector<1x1x8xf32>
    %45 = vector.broadcast %44 : vector<1x1x8xf32> to vector<4x8x8xf32>
    %46 = arith.addf %43, %45 : vector<4x8x8xf32>
    %cst_45 = arith.constant dense<0xFF800000> : vector<4x8xf32>
    %47 = vector.multi_reduction <maximumf>, %46, %cst_45 [2] : vector<4x8x8xf32> to vector<4x8xf32>
    %cst_46 = arith.constant 0xFF800000 : f32
    %48 = vector.broadcast %cst_46 : f32 to vector<4x8xf32>
    %49 = arith.maximumf %48, %47 : vector<4x8xf32>
    %50 = vector.shape_cast %49 : vector<4x8xf32> to vector<4x8x1xf32>
    %51 = vector.broadcast %50 : vector<4x8x1xf32> to vector<4x8x8xf32>
    %52 = arith.subf %46, %51 : vector<4x8x8xf32>
    %53 = math.exp %52 : vector<4x8x8xf32>
    %cst_47 = arith.constant dense<0.000000e+00> : vector<4x8xf32>
    %54 = vector.multi_reduction <add>, %53, %cst_47 [2] : vector<4x8x8xf32> to vector<4x8xf32>
    %55 = vector.shape_cast %54 : vector<4x8xf32> to vector<4x8x1xf32>
    %56 = vector.broadcast %55 : vector<4x8x1xf32> to vector<4x8x8xf32>
    %57 = arith.divf %53, %56 : vector<4x8x8xf32>
    "tpu.trace_start"() <{level = 10 : i32, message = "hqk,hkd->hqd"}> : () -> ()
    %cst_48 = arith.constant dense<0.000000e+00> : vector<4x8x8xf32>
    %58 = tpu.matmul %57, %42, %cst_48 {dimension_numbers = #tpu.dot_dimension_numbers<[2], [1], [1], [2], [0, 0, 0, 1, 1, 2], [0], [0]>} : vector<4x8x8xf32>, vector<4x8x8xf32>, vector<4x8x8xf32> -> vector<4x8x8xf32>
    "tpu.trace_stop"() : () -> ()
    "tpu.trace_start"() <{level = 10 : i32, message = "hqd,hed->hqe"}> : () -> ()
    %cst_49 = arith.constant dense<0.000000e+00> : vector<4x8x32xf32>
    %59 = tpu.matmul %58, %16, %cst_49 {dimension_numbers = #tpu.dot_dimension_numbers<[2], [2], [1], [1], [0, 0, 0, 1, 1, 1], [0], [0]>} : vector<4x8x8xf32>, vector<4x32x8xf32>, vector<4x8x32xf32> -> vector<4x8x32xf32>
    "tpu.trace_stop"() : () -> ()
    %cst_50 = arith.constant dense<0.000000e+00> : vector<8x32xf32>
    %60 = vector.multi_reduction <add>, %59, %cst_50 [0] : vector<4x8x32xf32> to vector<8x32xf32>
    %61 = vector.broadcast %24 : vector<1x32xf32> to vector<8x32xf32>
    %62 = arith.addf %60, %61 : vector<8x32xf32>
    %63 = arith.addf %12, %62 : vector<8x32xf32>
    %cst_51 = arith.constant dense<0.000000e+00> : vector<8xf32>
    %64 = vector.multi_reduction <add>, %63, %cst_51 [1] : vector<8x32xf32> to vector<8xf32>
    %65 = vector.shape_cast %64 : vector<8xf32> to vector<8x1xf32>
    %cst_52 = arith.constant 3.200000e+01 : f32
    %66 = vector.broadcast %cst_52 : f32 to vector<8x1xf32>
    %67 = arith.divf %65, %66 : vector<8x1xf32>
    %68 = vector.broadcast %67 : vector<8x1xf32> to vector<8x32xf32>
    %69 = arith.subf %63, %68 : vector<8x32xf32>
    %70 = arith.mulf %69, %69 : vector<8x32xf32>
    %cst_53 = arith.constant dense<0.000000e+00> : vector<8xf32>
    %71 = vector.multi_reduction <add>, %70, %cst_53 [1] : vector<8x32xf32> to vector<8xf32>
    %72 = vector.shape_cast %71 : vector<8xf32> to vector<8x1xf32>
    %cst_54 = arith.constant 3.200000e+01 : f32
    %73 = vector.broadcast %cst_54 : f32 to vector<8x1xf32>
    %74 = arith.divf %72, %73 : vector<8x1xf32>
    %75 = vector.broadcast %67 : vector<8x1xf32> to vector<8x32xf32>
    %76 = arith.subf %63, %75 : vector<8x32xf32>
    %cst_55 = arith.constant 9.99999974E-6 : f32
    %77 = vector.broadcast %cst_55 : f32 to vector<8x1xf32>
    %78 = arith.addf %74, %77 : vector<8x1xf32>
    %79 = math.rsqrt %78 : vector<8x1xf32>
    %80 = vector.broadcast %79 : vector<8x1xf32> to vector<8x32xf32>
    %81 = arith.mulf %76, %80 : vector<8x32xf32>
    %82 = vector.broadcast %25 : vector<1x32xf32> to vector<8x32xf32>
    %83 = arith.mulf %81, %82 : vector<8x32xf32>
    %84 = vector.broadcast %26 : vector<1x32xf32> to vector<8x32xf32>
    %85 = arith.addf %83, %84 : vector<8x32xf32>
    %cst_56 = arith.constant dense<0.000000e+00> : vector<8x64xf32>
    %86 = tpu.matmul %85, %21, %cst_56 {dimension_numbers = #tpu.dot_dimension_numbers<[1], [0], [0], [1], [0, 0, 1, 1], [], []>} : vector<8x32xf32>, vector<32x64xf32>, vector<8x64xf32> -> vector<8x64xf32>
    %87 = vector.broadcast %30 : vector<1x64xf32> to vector<8x64xf32>
    %88 = arith.addf %86, %87 : vector<8x64xf32>
    %cst_57 = arith.constant 0.000000e+00 : f32
    %89 = vector.broadcast %cst_57 : f32 to vector<8x64xf32>
    %90 = arith.maximumf %88, %89 : vector<8x64xf32>
    %cst_58 = arith.constant dense<0.000000e+00> : vector<8x32xf32>
    %91 = tpu.matmul %90, %23, %cst_58 {dimension_numbers = #tpu.dot_dimension_numbers<[1], [1], [0], [0], [0, 0, 1, 0], [], []>} : vector<8x64xf32>, vector<32x64xf32>, vector<8x32xf32> -> vector<8x32xf32>
    %92 = vector.broadcast %29 : vector<1x32xf32> to vector<8x32xf32>
    %93 = arith.addf %91, %92 : vector<8x32xf32>
    %94 = arith.addf %85, %93 : vector<8x32xf32>
    %cst_59 = arith.constant dense<0.000000e+00> : vector<8xf32>
    %95 = vector.multi_reduction <add>, %94, %cst_59 [1] : vector<8x32xf32> to vector<8xf32>
    %96 = vector.shape_cast %95 : vector<8xf32> to vector<8x1xf32>
    %cst_60 = arith.constant 3.200000e+01 : f32
    %97 = vector.broadcast %cst_60 : f32 to vector<8x1xf32>
    %98 = arith.divf %96, %97 : vector<8x1xf32>
    %99 = vector.broadcast %98 : vector<8x1xf32> to vector<8x32xf32>
    %100 = arith.subf %94, %99 : vector<8x32xf32>
    %101 = arith.mulf %100, %100 : vector<8x32xf32>
    %cst_61 = arith.constant dense<0.000000e+00> : vector<8xf32>
    %102 = vector.multi_reduction <add>, %101, %cst_61 [1] : vector<8x32xf32> to vector<8xf32>
    %103 = vector.shape_cast %102 : vector<8xf32> to vector<8x1xf32>
    %cst_62 = arith.constant 3.200000e+01 : f32
    %104 = vector.broadcast %cst_62 : f32 to vector<8x1xf32>
    %105 = arith.divf %103, %104 : vector<8x1xf32>
    %106 = vector.broadcast %98 : vector<8x1xf32> to vector<8x32xf32>
    %107 = arith.subf %94, %106 : vector<8x32xf32>
    %cst_63 = arith.constant 9.99999974E-6 : f32
    %108 = vector.broadcast %cst_63 : f32 to vector<8x1xf32>
    %109 = arith.addf %105, %108 : vector<8x1xf32>
    %110 = math.rsqrt %109 : vector<8x1xf32>
    %111 = vector.broadcast %110 : vector<8x1xf32> to vector<8x32xf32>
    %112 = arith.mulf %107, %111 : vector<8x32xf32>
    %113 = vector.broadcast %27 : vector<1x32xf32> to vector<8x32xf32>
    %114 = arith.mulf %112, %113 : vector<8x32xf32>
    %115 = vector.broadcast %28 : vector<1x32xf32> to vector<8x32xf32>
    %116 = arith.addf %114, %115 : vector<8x32xf32>
    %c16 = arith.constant 16 : index
    %c0_64 = arith.constant 0 : index
    %c0_65 = arith.constant 0 : index
    %117 = vector.load %arg4[%c16, %c0_64, %c0_65] : memref<32x32x8xf32, #tpu.memory_space<vmem>>, vector<4x32x8xf32>
    %c20 = arith.constant 20 : index
    %c0_66 = arith.constant 0 : index
    %c0_67 = arith.constant 0 : index
    %118 = vector.load %arg4[%c20, %c0_66, %c0_67] : memref<32x32x8xf32, #tpu.memory_space<vmem>>, vector<4x32x8xf32>
    %c24 = arith.constant 24 : index
    %c0_68 = arith.constant 0 : index
    %c0_69 = arith.constant 0 : index
    %119 = vector.load %arg4[%c24, %c0_68, %c0_69] : memref<32x32x8xf32, #tpu.memory_space<vmem>>, vector<4x32x8xf32>
    %c28 = arith.constant 28 : index
    %c0_70 = arith.constant 0 : index
    %c0_71 = arith.constant 0 : index
    %120 = vector.load %arg4[%c28, %c0_70, %c0_71] : memref<32x32x8xf32, #tpu.memory_space<vmem>>, vector<4x32x8xf32>
    %c12_72 = arith.constant 12 : index
    %c0_73 = arith.constant 0 : index
    %c0_74 = arith.constant 0 : index
    %121 = vector.load %arg5[%c12_72, %c0_73, %c0_74] : memref<24x1x8xf32, #tpu.memory_space<vmem>>, vector<4x1x8xf32>
    %c16_75 = arith.constant 16 : index
    %c0_76 = arith.constant 0 : index
    %c0_77 = arith.constant 0 : index
    %122 = vector.load %arg5[%c16_75, %c0_76, %c0_77] : memref<24x1x8xf32, #tpu.memory_space<vmem>>, vector<4x1x8xf32>
    %c20_78 = arith.constant 20 : index
    %c0_79 = arith.constant 0 : index
    %c0_80 = arith.constant 0 : index
    %123 = vector.load %arg5[%c20_78, %c0_79, %c0_80] : memref<24x1x8xf32, #tpu.memory_space<vmem>>, vector<4x1x8xf32>
    %c2_81 = arith.constant 2 : index
    %c0_82 = arith.constant 0 : index
    %c0_83 = arith.constant 0 : index
    %124 = vector.load %arg6[%c2_81, %c0_82, %c0_83] : memref<4x32x64xf32, #tpu.memory_space<vmem>>, vector<1x32x64xf32>
    %125 = vector.shape_cast %124 : vector<1x32x64xf32> to vector<32x64xf32>
    %c3_84 = arith.constant 3 : index
    %c0_85 = arith.constant 0 : index
    %c0_86 = arith.constant 0 : index
    %126 = vector.load %arg6[%c3_84, %c0_85, %c0_86] : memref<4x32x64xf32, #tpu.memory_space<vmem>>, vector<1x32x64xf32>
    %127 = vector.shape_cast %126 : vector<1x32x64xf32> to vector<32x64xf32>
    %c7 = arith.constant 7 : index
    %c0_87 = arith.constant 0 : index
    %128 = vector.load %arg7[%c7, %c0_87] : memref<14x64xf32, #tpu.memory_space<vmem>>, vector<1x32xf32>
    %c8_88 = arith.constant 8 : index
    %c0_89 = arith.constant 0 : index
    %129 = vector.load %arg7[%c8_88, %c0_89] : memref<14x64xf32, #tpu.memory_space<vmem>>, vector<1x32xf32>
    %c9 = arith.constant 9 : index
    %c0_90 = arith.constant 0 : index
    %130 = vector.load %arg7[%c9, %c0_90] : memref<14x64xf32, #tpu.memory_space<vmem>>, vector<1x32xf32>
    %c10 = arith.constant 10 : index
    %c0_91 = arith.constant 0 : index
    %131 = vector.load %arg7[%c10, %c0_91] : memref<14x64xf32, #tpu.memory_space<vmem>>, vector<1x32xf32>
    %c11 = arith.constant 11 : index
    %c0_92 = arith.constant 0 : index
    %132 = vector.load %arg7[%c11, %c0_92] : memref<14x64xf32, #tpu.memory_space<vmem>>, vector<1x32xf32>
    %c12_93 = arith.constant 12 : index
    %c0_94 = arith.constant 0 : index
    %133 = vector.load %arg7[%c12_93, %c0_94] : memref<14x64xf32, #tpu.memory_space<vmem>>, vector<1x32xf32>
    %c13 = arith.constant 13 : index
    %c0_95 = arith.constant 0 : index
    %134 = vector.load %arg7[%c13, %c0_95] : memref<14x64xf32, #tpu.memory_space<vmem>>, vector<1x64xf32>
    %135 = vector.shape_cast %116 : vector<8x32xf32> to vector<1x8x32xf32>
    %136 = vector.shape_cast %135 : vector<1x8x32xf32> to vector<1x8x32xf32>
    %137 = vector.broadcast %136 : vector<1x8x32xf32> to vector<4x8x32xf32>
    "tpu.trace_start"() <{level = 10 : i32, message = "hsk,hkd->hsd"}> : () -> ()
    %cst_96 = arith.constant dense<0.000000e+00> : vector<4x8x8xf32>
    %138 = tpu.matmul %137, %117, %cst_96 {dimension_numbers = #tpu.dot_dimension_numbers<[2], [1], [1], [2], [0, 0, 0, 1, 1, 2], [0], [0]>} : vector<4x8x32xf32>, vector<4x32x8xf32>, vector<4x8x8xf32> -> vector<4x8x8xf32>
    "tpu.trace_stop"() : () -> ()
    %139 = vector.broadcast %121 : vector<4x1x8xf32> to vector<4x8x8xf32>
    %140 = arith.addf %138, %139 : vector<4x8x8xf32>
    "tpu.trace_start"() <{level = 10 : i32, message = "hsk,hkd->hsd"}> : () -> ()
    %cst_97 = arith.constant dense<0.000000e+00> : vector<4x8x8xf32>
    %141 = tpu.matmul %137, %118, %cst_97 {dimension_numbers = #tpu.dot_dimension_numbers<[2], [1], [1], [2], [0, 0, 0, 1, 1, 2], [0], [0]>} : vector<4x8x32xf32>, vector<4x32x8xf32>, vector<4x8x8xf32> -> vector<4x8x8xf32>
    "tpu.trace_stop"() : () -> ()
    %142 = vector.broadcast %122 : vector<4x1x8xf32> to vector<4x8x8xf32>
    %143 = arith.addf %141, %142 : vector<4x8x8xf32>
    "tpu.trace_start"() <{level = 10 : i32, message = "hsk,hkd->hsd"}> : () -> ()
    %cst_98 = arith.constant dense<0.000000e+00> : vector<4x8x8xf32>
    %144 = tpu.matmul %137, %119, %cst_98 {dimension_numbers = #tpu.dot_dimension_numbers<[2], [1], [1], [2], [0, 0, 0, 1, 1, 2], [0], [0]>} : vector<4x8x32xf32>, vector<4x32x8xf32>, vector<4x8x8xf32> -> vector<4x8x8xf32>
    "tpu.trace_stop"() : () -> ()
    %145 = vector.broadcast %123 : vector<4x1x8xf32> to vector<4x8x8xf32>
    %146 = arith.addf %144, %145 : vector<4x8x8xf32>
    "tpu.trace_start"() <{level = 10 : i32, message = "hqd,hkd->hqk"}> : () -> ()
    %cst_99 = arith.constant dense<0.000000e+00> : vector<4x8x8xf32>
    %147 = tpu.matmul %140, %143, %cst_99 {dimension_numbers = #tpu.dot_dimension_numbers<[2], [2], [1], [1], [0, 0, 0, 1, 1, 1], [0], [0]>} : vector<4x8x8xf32>, vector<4x8x8xf32>, vector<4x8x8xf32> -> vector<4x8x8xf32>
    "tpu.trace_stop"() : () -> ()
    %148 = vector.shape_cast %3 : vector<1x8xf32> to vector<1x1x8xf32>
    %149 = vector.broadcast %148 : vector<1x1x8xf32> to vector<4x8x8xf32>
    %150 = arith.addf %147, %149 : vector<4x8x8xf32>
    %cst_100 = arith.constant dense<0xFF800000> : vector<4x8xf32>
    %151 = vector.multi_reduction <maximumf>, %150, %cst_100 [2] : vector<4x8x8xf32> to vector<4x8xf32>
    %cst_101 = arith.constant 0xFF800000 : f32
    %152 = vector.broadcast %cst_101 : f32 to vector<4x8xf32>
    %153 = arith.maximumf %152, %151 : vector<4x8xf32>
    %154 = vector.shape_cast %153 : vector<4x8xf32> to vector<4x8x1xf32>
    %155 = vector.broadcast %154 : vector<4x8x1xf32> to vector<4x8x8xf32>
    %156 = arith.subf %150, %155 : vector<4x8x8xf32>
    %157 = math.exp %156 : vector<4x8x8xf32>
    %cst_102 = arith.constant dense<0.000000e+00> : vector<4x8xf32>
    %158 = vector.multi_reduction <add>, %157, %cst_102 [2] : vector<4x8x8xf32> to vector<4x8xf32>
    %159 = vector.shape_cast %158 : vector<4x8xf32> to vector<4x8x1xf32>
    %160 = vector.broadcast %159 : vector<4x8x1xf32> to vector<4x8x8xf32>
    %161 = arith.divf %157, %160 : vector<4x8x8xf32>
    "tpu.trace_start"() <{level = 10 : i32, message = "hqk,hkd->hqd"}> : () -> ()
    %cst_103 = arith.constant dense<0.000000e+00> : vector<4x8x8xf32>
    %162 = tpu.matmul %161, %146, %cst_103 {dimension_numbers = #tpu.dot_dimension_numbers<[2], [1], [1], [2], [0, 0, 0, 1, 1, 2], [0], [0]>} : vector<4x8x8xf32>, vector<4x8x8xf32>, vector<4x8x8xf32> -> vector<4x8x8xf32>
    "tpu.trace_stop"() : () -> ()
    "tpu.trace_start"() <{level = 10 : i32, message = "hqd,hed->hqe"}> : () -> ()
    %cst_104 = arith.constant dense<0.000000e+00> : vector<4x8x32xf32>
    %163 = tpu.matmul %162, %120, %cst_104 {dimension_numbers = #tpu.dot_dimension_numbers<[2], [2], [1], [1], [0, 0, 0, 1, 1, 1], [0], [0]>} : vector<4x8x8xf32>, vector<4x32x8xf32>, vector<4x8x32xf32> -> vector<4x8x32xf32>
    "tpu.trace_stop"() : () -> ()
    %cst_105 = arith.constant dense<0.000000e+00> : vector<8x32xf32>
    %164 = vector.multi_reduction <add>, %163, %cst_105 [0] : vector<4x8x32xf32> to vector<8x32xf32>
    %165 = vector.broadcast %128 : vector<1x32xf32> to vector<8x32xf32>
    %166 = arith.addf %164, %165 : vector<8x32xf32>
    %167 = arith.addf %116, %166 : vector<8x32xf32>
    %cst_106 = arith.constant dense<0.000000e+00> : vector<8xf32>
    %168 = vector.multi_reduction <add>, %167, %cst_106 [1] : vector<8x32xf32> to vector<8xf32>
    %169 = vector.shape_cast %168 : vector<8xf32> to vector<8x1xf32>
    %cst_107 = arith.constant 3.200000e+01 : f32
    %170 = vector.broadcast %cst_107 : f32 to vector<8x1xf32>
    %171 = arith.divf %169, %170 : vector<8x1xf32>
    %172 = vector.broadcast %171 : vector<8x1xf32> to vector<8x32xf32>
    %173 = arith.subf %167, %172 : vector<8x32xf32>
    %174 = arith.mulf %173, %173 : vector<8x32xf32>
    %cst_108 = arith.constant dense<0.000000e+00> : vector<8xf32>
    %175 = vector.multi_reduction <add>, %174, %cst_108 [1] : vector<8x32xf32> to vector<8xf32>
    %176 = vector.shape_cast %175 : vector<8xf32> to vector<8x1xf32>
    %cst_109 = arith.constant 3.200000e+01 : f32
    %177 = vector.broadcast %cst_109 : f32 to vector<8x1xf32>
    %178 = arith.divf %176, %177 : vector<8x1xf32>
    %179 = vector.broadcast %171 : vector<8x1xf32> to vector<8x32xf32>
    %180 = arith.subf %167, %179 : vector<8x32xf32>
    %cst_110 = arith.constant 9.99999974E-6 : f32
    %181 = vector.broadcast %cst_110 : f32 to vector<8x1xf32>
    %182 = arith.addf %178, %181 : vector<8x1xf32>
    %183 = math.rsqrt %182 : vector<8x1xf32>
    %184 = vector.broadcast %183 : vector<8x1xf32> to vector<8x32xf32>
    %185 = arith.mulf %180, %184 : vector<8x32xf32>
    %186 = vector.broadcast %129 : vector<1x32xf32> to vector<8x32xf32>
    %187 = arith.mulf %185, %186 : vector<8x32xf32>
    %188 = vector.broadcast %130 : vector<1x32xf32> to vector<8x32xf32>
    %189 = arith.addf %187, %188 : vector<8x32xf32>
    %cst_111 = arith.constant dense<0.000000e+00> : vector<8x64xf32>
    %190 = tpu.matmul %189, %125, %cst_111 {dimension_numbers = #tpu.dot_dimension_numbers<[1], [0], [0], [1], [0, 0, 1, 1], [], []>} : vector<8x32xf32>, vector<32x64xf32>, vector<8x64xf32> -> vector<8x64xf32>
    %191 = vector.broadcast %134 : vector<1x64xf32> to vector<8x64xf32>
    %192 = arith.addf %190, %191 : vector<8x64xf32>
    %cst_112 = arith.constant 0.000000e+00 : f32
    %193 = vector.broadcast %cst_112 : f32 to vector<8x64xf32>
    %194 = arith.maximumf %192, %193 : vector<8x64xf32>
    %cst_113 = arith.constant dense<0.000000e+00> : vector<8x32xf32>
    %195 = tpu.matmul %194, %127, %cst_113 {dimension_numbers = #tpu.dot_dimension_numbers<[1], [1], [0], [0], [0, 0, 1, 0], [], []>} : vector<8x64xf32>, vector<32x64xf32>, vector<8x32xf32> -> vector<8x32xf32>
    %196 = vector.broadcast %133 : vector<1x32xf32> to vector<8x32xf32>
    %197 = arith.addf %195, %196 : vector<8x32xf32>
    %198 = arith.addf %189, %197 : vector<8x32xf32>
    %cst_114 = arith.constant dense<0.000000e+00> : vector<8xf32>
    %199 = vector.multi_reduction <add>, %198, %cst_114 [1] : vector<8x32xf32> to vector<8xf32>
    %200 = vector.shape_cast %199 : vector<8xf32> to vector<8x1xf32>
    %cst_115 = arith.constant 3.200000e+01 : f32
    %201 = vector.broadcast %cst_115 : f32 to vector<8x1xf32>
    %202 = arith.divf %200, %201 : vector<8x1xf32>
    %203 = vector.broadcast %202 : vector<8x1xf32> to vector<8x32xf32>
    %204 = arith.subf %198, %203 : vector<8x32xf32>
    %205 = arith.mulf %204, %204 : vector<8x32xf32>
    %cst_116 = arith.constant dense<0.000000e+00> : vector<8xf32>
    %206 = vector.multi_reduction <add>, %205, %cst_116 [1] : vector<8x32xf32> to vector<8xf32>
    %207 = vector.shape_cast %206 : vector<8xf32> to vector<8x1xf32>
    %cst_117 = arith.constant 3.200000e+01 : f32
    %208 = vector.broadcast %cst_117 : f32 to vector<8x1xf32>
    %209 = arith.divf %207, %208 : vector<8x1xf32>
    %210 = vector.broadcast %202 : vector<8x1xf32> to vector<8x32xf32>
    %211 = arith.subf %198, %210 : vector<8x32xf32>
    %cst_118 = arith.constant 9.99999974E-6 : f32
    %212 = vector.broadcast %cst_118 : f32 to vector<8x1xf32>
    %213 = arith.addf %209, %212 : vector<8x1xf32>
    %214 = math.rsqrt %213 : vector<8x1xf32>
    %215 = vector.broadcast %214 : vector<8x1xf32> to vector<8x32xf32>
    %216 = arith.mulf %211, %215 : vector<8x32xf32>
    %217 = vector.broadcast %131 : vector<1x32xf32> to vector<8x32xf32>
    %218 = arith.mulf %216, %217 : vector<8x32xf32>
    %219 = vector.broadcast %132 : vector<1x32xf32> to vector<8x32xf32>
    %220 = arith.addf %218, %219 : vector<8x32xf32>
    %c0_119 = arith.constant 0 : index
    %c0_120 = arith.constant 0 : index
    %c0_121 = arith.constant 0 : index
    %221 = vector.load %arg8[%c0_119, %c0_120, %c0_121] : memref<1x8x32xf32, #tpu.memory_space<vmem>>, vector<1x8x32xf32>
    %222 = vector.shape_cast %221 : vector<1x8x32xf32> to vector<8x32xf32>
    %223 = vector.shape_cast %220 : vector<8x32xf32> to vector<1x8x32xf32>
    tpu.vector_store %arg8[%c0_119, %c0_120, %c0_121], %223 {strides = array<i32>} : memref<1x8x32xf32, #tpu.memory_space<vmem>>, vector<1x8x32xf32>,
    return
  }
  func.func @transform_0(%arg0: i32) -> (i32, i32, i32) {
    %c0_i32 = arith.constant 0 : i32
    %c0_i32_0 = arith.constant 0 : i32
    %c0_i32_1 = arith.constant 0 : i32
    return %arg0, %c0_i32, %c0_i32_0 : i32, i32, i32
  }
  func.func @transform_1(%arg0: i32) -> (i32, i32, i32) {
    %c0_i32 = arith.constant 0 : i32
    %c0_i32_0 = arith.constant 0 : i32
    %c0_i32_1 = arith.constant 0 : i32
    return %arg0, %c0_i32, %c0_i32_0 : i32, i32, i32
  }
  func.func @transform_2(%arg0: i32) -> (i32, i32) {
    %c0_i32 = arith.constant 0 : i32
    %c0_i32_0 = arith.constant 0 : i32
    %c0_i32_1 = arith.constant 0 : i32
    return %c0_i32, %c0_i32_0 : i32, i32
  }
  func.func @transform_3(%arg0: i32) -> (i32, i32, i32) {
    %c0_i32 = arith.constant 0 : i32
    %c0_i32_0 = arith.constant 0 : i32
    %c0_i32_1 = arith.constant 0 : i32
    %c0_i32_2 = arith.constant 0 : i32
    return %c0_i32, %c0_i32_0, %c0_i32_1 : i32, i32, i32
  }
  func.func @transform_4(%arg0: i32) -> (i32, i32, i32) {
    %c0_i32 = arith.constant 0 : i32
    %c0_i32_0 = arith.constant 0 : i32
    %c0_i32_1 = arith.constant 0 : i32
    %c0_i32_2 = arith.constant 0 : i32
    return %c0_i32, %c0_i32_0, %c0_i32_1 : i32, i32, i32
  }
  func.func @transform_5(%arg0: i32) -> (i32, i32, i32) {
    %c0_i32 = arith.constant 0 : i32
    %c0_i32_0 = arith.constant 0 : i32
    %c0_i32_1 = arith.constant 0 : i32
    %c0_i32_2 = arith.constant 0 : i32
    return %c0_i32, %c0_i32_0, %c0_i32_1 : i32, i32, i32
  }
  func.func @transform_6(%arg0: i32) -> (i32, i32) {
    %c0_i32 = arith.constant 0 : i32
    %c0_i32_0 = arith.constant 0 : i32
    %c0_i32_1 = arith.constant 0 : i32
    return %c0_i32, %c0_i32_0 : i32, i32
  }
  func.func @transform_7(%arg0: i32) -> (i32, i32, i32) {
    %c0_i32 = arith.constant 0 : i32
    %c0_i32_0 = arith.constant 0 : i32
    %c0_i32_1 = arith.constant 0 : i32
    return %arg0, %c0_i32, %c0_i32_0 : i32, i32, i32
  }
}

</mosaic_0001>

<bundles_post_ra>
// kernel: tpu_custom_call.1
= control target key start
LH: loop header
LB: loop body
LE: loop exit
PB: predicated region body
PF: predicated region fallthrough
CT: control target
= control target key end

     0   :  { %12 = vsyncpa [#allocation3], 0  ;;  %s3657_s0 = inlined_call_operand.vmem [shape: s32[2,8,1], index: 0, kind: input, shape index: {}]   ;;  %s3658_s1 = inlined_call_operand.vmem [shape: f32[2,1,8], index: 1, kind: input, shape index: {}]   ;;  %s3659_s2 = inlined_call_operand.vmem [shape: f32[40,32], index: 2, kind: input, shape index: {}]   ;;  %s3660_s3 = inlined_call_operand.vmem [shape: f32[32,32,8], index: 3, kind: input, shape index: {}]   ;;  %s3661_s4 = inlined_call_operand.vmem [shape: f32[24,1,8], index: 4, kind: input, shape index: {}]   ;;  %s3662_s5 = inlined_call_operand.vmem [shape: f32[4,32,64], index: 5, kind: input, shape index: {}]   ;;  %s3663_s6 = inlined_call_operand.vmem [shape: f32[14,64], index: 6, kind: input, shape index: {}]   ;;  %s3664_s7 = inlined_call_operand.hbm [shape: f32[2,8,32], index: 7, kind: output, shape index: {}]  }
   0x1   :  { %14 = vsyncpa [#allocation3 + $0x1], 0  ;;  %s2778_s24 = smov 0   ;;  %s2780_s25 = smov 0  }
   0x2   :  { %s2782_s26 = smov 0   ;;  %s2784_s27 = smov 0  }
   0x3 LB: > { %s2799_s28 = sadd.s32 4294967295, %s2733_s27   ;;  %s2291_s29 = sadd.s32 4294967294, %s2733_s27   ;;  %s2733_s27 = sphi %s2784_s27, %s3670_s27   ;;  %s2729_s26 = sphi %s2782_s26, %s3669_s26   ;;  %s2725_s25 = sphi %s2780_s25, %s3668_s25   ;;  %s2721_s24 = sphi %s2778_s24, %s3667_s24  }
   0x4   : > { %s2803_s30 = sadd.s32 1, %s2733_s27   ;;  %s184_s8 = sadd.s32 1, %s2729_s26 }
   0x5   : > { %s181_s9 = ssub.s32 %s2733_s27, %s2803_s30  ;;  %p194_p0 = scmp.ne.s32.totalorder %s2729_s26, %s2725_s25 }
   0x6   : > { %p182_p1 = scmp.eq.s32.totalorder %s181_s9, 0  ;;  %p195_p2 = scmp.eq.s32.totalorder %s2799_s28, 1 }
   0x7   : > { %p200_p3 = scmp.ne.s32.totalorder %s2725_s25, %s2721_s24  ;;  %p201_p4 = scmp.eq.s32.totalorder %s2291_s29, 1 }
   0x8   : > { %s2814_s10 = scalar_select %p182_p1, %s2729_s26, %s184_s8  }
   0x9   : > { %p2816_p5 = por %p195_p2, %p194_p0  ;;  %p2820_p6 = por %p201_p4, %p200_p3 }
   0xa   : > { %p2294_p7 = scmp.ge.s32.totalorder %s2733_s27, 1  ;;  %p247_p8 = scmp.lt.s32.totalorder %s2733_s27, 3 }
   0xc   : > { %p248_p9 = pnand %p2294_p7, %p247_p8 }
   0xd   : > { %p281_p10 = scmp.lt.s32.totalorder (!%p248_p9), %s2799_s28, 1  ;;  %s278_s21 = sand.u32 (!%p248_p9), 1, %s2725_s25  }
   0xe   : > { %251 = sbr.rel (%p248_p9) target bundleno = 3520 (0xdc0), region = 48  ;;  %s2295_s22 = sshll.u32 (!%p248_p9), %s278_s21, 3 }
   0xf   : > { %s280_s18 = scalar_lea.vmem (!%p248_p9), [#allocation2], %s2295_s22  ;;  %s2691_s22 = scalar_lea.hbm (!%p248_p9), %s3664_s7, 16 }
  0x13   : > { %v301_v0 = vld [vmem:[%s3659_s2 + $0x18] sm:$0xff]  ;;  %v300_v1 = vld [vmem:[%s3659_s2 + $0x10] sm:$0xff]  ;;  %v2735_v2 = vmov 0   ;;  %s2834_s17 = scalar_select %p281_p10, %s2799_s28, 1  ;;  %v299_v3 = vld [vmem:[%s3659_s2 + $0x8] sm:$0xff]  ;;  %v290_v14 = vlaneseq  ;;  %vm303_vm0 = vcmask 261120  }
  0x14   : > { %2589 = vset.pattern.permute.xlu0 %v2735_v2  ;;  %319 = vmatpush.msra.mxu0 %v301_v0  ;;  %v298_v5 = vld [vmem:[%s3659_s2] sm:$0xff]  ;;  %v330_v6 = vld [vmem:[%s3660_s3 + $0x18] sm:$0xff]  ;;  %v329_v10 = vld [vmem:[%s3660_s3 + $0x10] sm:$0xff]  ;;  %v2736_v17 = vmov 0.0   ;;  %vm706_vm2 = vcmask 64512  }
  0x15   : > { %s2296_s20 = sshll.u32 %s2834_s17, 3  ;;  %s287_s23 = scalar_lea.vmem %s3658_s1, %s2834_s17  ;;  %v338_v7 = vld [vmem:[%s3660_s3 + $0x58] sm:$0xff]  ;;  %451 = vmatpush.msra.mxu2 %v330_v6  ;;  %v337_v11 = vld [vmem:[%s3660_s3 + $0x50] sm:$0xff]  ;;  %v291_v15 = vand.u32 127, %v290_v14  ;;  %v328_v19 = vld [vmem:[%s3660_s3 + $0x8] sm:$0xff] }
  0x16   : > { %320 = vmatpush.msra.mxu0 %v300_v1  ;;  %s284_s9 = scalar_lea.vmem %s3657_s0, %s2296_s20  ;;  %v342_v8 = vld [vmem:[%s3660_s3 + $0x78] sm:$0xff]  ;;  %491 = vmatpush.msra.mxu3 %v338_v7  ;;  %v341_v12 = vld [vmem:[%s3660_s3 + $0x70] sm:$0xff]  ;;  %v336_v20 = vld [vmem:[%s3660_s3 + $0x48] sm:$0xff]  ;;  %s2544_s20 = sshll.u32 %s2799_s28, 3 }
  0x17   : > { %v288_v4 = vld [vmem:[%s284_s9] sm:$0xff]  ;;  %v2302_v9 = vld [vmem:[%s3660_s3 + $0x98] sm:$0xff]  ;;  %v2301_v13 = vld [vmem:[%s3660_s3 + $0x90] sm:$0xff]  ;;  %452 = vmatpush.msra.mxu2 %v329_v10  ;;  %s2218_s14 = scalar_lea.hbm %s3664_s7, %s2544_s20  ;;  %s2220_s28 = sshll.u32 %s280_s18, 4  ;;  %s2221_s28 = int_to_ptr.vmem [resolvable:$true] %s2220_s28 }
  0x18   : > { %321 = vmatpush.msra.mxu0 %v299_v3  ;;  %293 = vperm.xlu0 %2589, %v288_v4   ;;  %v340_v21 = vld [vmem:[%s3660_s3 + $0x68] sm:$0xff]  ;;  %v327_v23 = vld [vmem:[%s3660_s3] sm:$0xff]  ;;  %v334_v27 = vld [vmem:[%s3660_s3 + $0x38] sm:$0xff]  ;;  %s2222_s19 = sshll.u32 %s2218_s14, 4  ;;  %s2208_s17 = scalar_lea.sflag [#allocation3], %s278_s21  ;;  %s2223_s19 = int_to_ptr.hbm [resolvable:$true] %s2222_s19 }
  0x19   : > { %543 = vmatpush.msra.mxu1 %v2302_v9  ;;  %492 = vmatpush.msra.mxu3 %v337_v11  ;;  %v2300_v22 = vld [vmem:[%s3660_s3 + $0x88] sm:$0xff]  ;;  %v335_v24 = vld [vmem:[%s3660_s3 + $0x40] sm:$0xff]  ;;  %v2310_v28 = vld [vmem:[%s3660_s3 + $0xd8] sm:$0xff] }
  0x1a   : > { %322 = vmatpush.msra.mxu0 %v298_v5  ;;  %453 = vmatpush.msra.mxu2 %v328_v19  ;;  %v339_v25 = vld [vmem:[%s3660_s3 + $0x60] sm:$0xff]  ;;  %v2314_v29 = vld [vmem:[%s3660_s3 + $0xf8] sm:$0xff]  ;;  %v333_v31 = vld [vmem:[%s3660_s3 + $0x30] sm:$0xff] }
  0x1b   : > { %544 = vmatpush.msra.mxu1 %v2301_v13  ;;  %493 = vmatpush.msra.mxu3 %v336_v20  ;;  %v2299_v26 = vld [vmem:[%s3660_s3 + $0x80] sm:$0xff]  ;;  %v2318_v30 = vld [vmem:[%s3660_s3 + $0x118] sm:$0xff]  ;;  %v2309_v32 = vld [vmem:[%s3660_s3 + $0xd0] sm:$0xff] }
  0x1c   : > { %511 = vmatpush.msrb.mxu0 %v342_v8  ;;  %454 = vmatpush.msra.mxu2 %v327_v23  ;;  %v2313_v33 = vld [vmem:[%s3660_s3 + $0xf0] sm:$0xff]  ;;  %v332_v35 = vld [vmem:[%s3660_s3 + $0x28] sm:$0xff]  ;;  %v331_v39 = vld [vmem:[%s3660_s3 + $0x20] sm:$0xff] }
  0x1d   : > { %545 = vmatpush.msra.mxu1 %v2300_v22  ;;  %494 = vmatpush.msra.mxu3 %v335_v24  ;;  %v2317_v34 = vld [vmem:[%s3660_s3 + $0x110] sm:$0xff]  ;;  %v2308_v36 = vld [vmem:[%s3660_s3 + $0xc8] sm:$0xff]  ;;  %v2307_v40 = vld [vmem:[%s3660_s3 + $0xc0] sm:$0xff] }
  0x1e   : > { %512 = vmatpush.msrb.mxu0 %v341_v12  ;;  %471 = vmatpush.msrb.mxu2 %v334_v27  ;;  %v2312_v37 = vld [vmem:[%s3660_s3 + $0xe8] sm:$0xff]  ;;  %v2311_v41 = vld [vmem:[%s3660_s3 + $0xe0] sm:$0xff]  ;;  %v2306_v46 = vld [vmem:[%s3660_s3 + $0xb8] sm:$0xff] }
  0x1f   : > { %546 = vmatpush.msra.mxu1 %v2299_v26  ;;  %583 = vmatpush.msrb.mxu3 %v2310_v28  ;;  %v2316_v38 = vld [vmem:[%s3660_s3 + $0x108] sm:$0xff]  ;;  %v2315_v42 = vld [vmem:[%s3660_s3 + $0x100] sm:$0xff]  ;;  %v2326_v47 = vld [vmem:[%s3660_s3 + $0x158] sm:$0xff] }
  0x20   : > { %513 = vmatpush.msrb.mxu0 %v340_v21  ;;  %472 = vmatpush.msrb.mxu2 %v333_v31  ;;  %v302_v43 = vld [vmem:[%s3659_s2 + $0x20] sm:$0xff]  ;;  %v2330_v48 = vld [vmem:[%s3660_s3 + $0x178] sm:$0xff]  ;;  %v2305_v49 = vld [vmem:[%s3660_s3 + $0xb0] sm:$0xff] }
  0x21   : > { %635 = vmatpush.msrb.mxu1 %v2318_v30  ;;  %584 = vmatpush.msrb.mxu3 %v2309_v32  ;;  %v2325_v50 = vld [vmem:[%s3660_s3 + $0x150] sm:$0xff]  ;;  %v2304_v52 = vld [vmem:[%s3660_s3 + $0xa8] sm:$0xff]  ;;  %v2303_v55 = vld [vmem:[%s3660_s3 + $0xa0] sm:$0xff] }
  0x22   : > { %514 = vmatpush.msrb.mxu0 %v339_v25  ;;  %473 = vmatpush.msrb.mxu2 %v332_v35  ;;  %v2329_v51 = vld [vmem:[%s3660_s3 + $0x170] sm:$0xff]  ;;  %v2324_v53 = vld [vmem:[%s3660_s3 + $0x148] sm:$0xff]  ;;  %v2323_v56 = vld [vmem:[%s3660_s3 + $0x140] sm:$0xff] }
  0x23   : > { %636 = vmatpush.msrb.mxu1 %v2317_v34  ;;  %585 = vmatpush.msrb.mxu3 %v2308_v36  ;;  %v2328_v54 = vld [vmem:[%s3660_s3 + $0x168] sm:$0xff]  ;;  %v2327_v57 = vld [vmem:[%s3660_s3 + $0x160] sm:$0xff]  ;;  %v2322_v58 = vld [vmem:[%s3660_s3 + $0x138] sm:$0xff] }
  0x24   : > { %474 = vmatpush.msrb.mxu2 %v331_v39  ;;  %v2321_v59 = vld [vmem:[%s3660_s3 + $0x130] sm:$0xff]  ;;  %v2320_v60 = vld [vmem:[%s3660_s3 + $0x128] sm:$0xff]  ;;  %v2319_v61 = vld [vmem:[%s3660_s3 + $0x120] sm:$0xff] }
  0x25   : > { %637 = vmatpush.msrb.mxu1 %v2316_v38  ;;  %586 = vmatpush.msrb.mxu3 %v2307_v40  ;;  %v2592_v62 = vld [vmem:[%s3661_s4 + $0x4] ss:$0 sm:$0xff]  ;;  %v2593_v2 = vld [vmem:[%s3661_s4] ss:$0 sm:$0xff]  ;;  %v2595_v5 = vld [vmem:[%s3661_s4 + $0x7] ss:$0 sm:$0xff] }
  0x26   : > { %v2596_v6 = vld [vmem:[%s3661_s4 + $0x8] ss:$0 sm:$0xff]  ;;  %v2591_v8 = vld [vmem:[%s3661_s4 + $0x3] ss:$0 sm:$0xff]  ;;  %v2598_v13 = vld [vmem:[%s3661_s4 + $0x6] ss:$0 sm:$0xff] }
  0x27   : > { %638 = vmatpush.msrb.mxu1 %v2315_v42  ;;  %v2600_v23 = vld [vmem:[%s3661_s4 + $0x5] ss:$0 sm:$0xff]  ;;  %v2601_v24 = vld [vmem:[%s3661_s4 + $0xa] ss:$0 sm:$0xff]  ;;  %v2597_v25 = vld [vmem:[%s3661_s4 + $0x1] ss:$0 sm:$0xff] }
  0x28   : > { %v2602_v31 = vld [vmem:[%s3661_s4 + $0x9] ss:$0 sm:$0xff]  ;;  %v3073_v34 = vld [vmem:[%s287_s23] ss:$0 sm:$0xff]  ;;  %s2685_s23 = sshra.s32 %s2223_s19, 4  ;;  %s2686_s23 = int_to_ptr.hbm [resolvable:$true] %s2685_s23 }
  0x29   : > { %s2687_s20 = scalar_lea.hbm %s2686_s23, 8  ;;  %p2692_p0 = scmp.lt.s32.totalorder %s2686_s23, %s3664_s7 }
  0x2a   : > { %p2688_p11 = scmp.ne.s32.totalorder %s2686_s23, %s2687_s20  ;;  %p2693_p1 = scmp.lt.s32.totalorder %s2691_s22, %s2687_s20 }
  0x2c   : > { %p2689_p12 = pnand %p2688_p11, %p2816_p5  ;;  %p2694_p2 = por %p2693_p1, %p2692_p0 }
  0x2e   : > { %p2690_p13 = pneg %p2689_p12 }
  0x30   : > { %p2695_p3 = pnand %p2694_p2, %p2690_p13 }
  0x8a   : > { %v294_v16 = vpop.permute.xlu0 %293 }
  0x8b   : > { %vm295_vm1 = vcmp.eq.s32.totalorder %v291_v15, %v294_v16  ;;  %v2594_v15 = vld [vmem:[%s3661_s4 + $0x2] ss:$0 sm:$0xff] }
  0x8c   : > { %v2297_v18 = vsel %vm295_vm1, 1.0, %v2736_v17 }
  0x8d   : > { %2298 = vmatmul.msk.f32.vlgmr.msra.gmra.mxu0 %vm303_vm0, %v2297_v18  ;;  %v2599_v18 = vld [vmem:[%s3661_s4 + $0xb] ss:$0 sm:$0xff] }
  0x8e   : > { %603 = vmatpush.msra.mxu0 %v2314_v29 }
  0x90   : > { %604 = vmatpush.msra.mxu0 %v2313_v33 }
  0x92   : > { %605 = vmatpush.msra.mxu0 %v2312_v37 }
  0x94   : > { %606 = vmatpush.msra.mxu0 %v2311_v41 }
 0x10a   : > { %v324_v44 = vpop.f32.mrf.mxu0 }
 0x10b   : > { %v2950_v45 = vadd.f32 %v324_v44, %v302_v43 }
 0x10d   : > { %2359 = vmatmul.msk.f32.vlgmr.msra.gmra.mxu2 %vm303_vm0, %v2950_v45  ;;  %2361 = vmatmul.msk.f32.vlgmr.msra.gmra.mxu3 %vm303_vm0, %v2950_v45 }
 0x10e   : > { %2362 = vmatmul.msk.f32.vlgmr.msrb.gmra.mxu0 %vm303_vm0, %v2950_v45  ;;  %2363 = vmatmul.msk.f32.vlgmr.msra.gmra.mxu1 %vm303_vm0, %v2950_v45 }
 0x10f   : > { %563 = vmatpush.msra.mxu2 %v2306_v46  ;;  %675 = vmatpush.msra.mxu3 %v2326_v47 }
 0x110   : > { %695 = vmatpush.msrb.mxu0 %v2330_v48 }
 0x111   : > { %564 = vmatpush.msra.mxu2 %v2305_v49  ;;  %676 = vmatpush.msra.mxu3 %v2325_v50 }
 0x112   : > { %696 = vmatpush.msrb.mxu0 %v2329_v51 }
 0x113   : > { %565 = vmatpush.msra.mxu2 %v2304_v52  ;;  %677 = vmatpush.msra.mxu3 %v2324_v53 }
 0x114   : > { %697 = vmatpush.msrb.mxu0 %v2328_v54 }
 0x115   : > { %2360 = vmatmul.msk.f32.vlgmr.msrb.gmra.mxu2 %vm303_vm0, %v2950_v45  ;;  %2365 = vmatmul.msk.f32.vlgmr.msrb.gmra.mxu3 %vm303_vm0, %v2950_v45 }
 0x116   : > { %2366 = vmatmul.msk.f32.vlgmr.msra.gmra.mxu0 %vm303_vm0, %v2950_v45  ;;  %2367 = vmatmul.msk.f32.vlgmr.msrb.gmra.mxu1 %vm303_vm0, %v2950_v45 }
 0x117   : > { %566 = vmatpush.msra.mxu2 %v2303_v55  ;;  %678 = vmatpush.msra.mxu3 %v2323_v56 }
 0x118   : > { %698 = vmatpush.msrb.mxu0 %v2327_v57 }
 0x119   : > { %655 = vmatpush.msrb.mxu2 %v2322_v58 }
 0x11b   : > { %656 = vmatpush.msrb.mxu2 %v2321_v59 }
 0x11d   : > { %657 = vmatpush.msrb.mxu2 %v2320_v60  ;;  %2369 = vmatmul.msk.f32.vlgmr.msra.gmra.mxu3 %vm303_vm0, %v2950_v45 }
 0x11e   : > { %2364 = vmatmul.msk.f32.vlgmr.msra.gmra.mxu2 %vm303_vm0, %v2950_v45  ;;  %2370 = vmatmul.msk.f32.vlgmr.msrb.gmra.mxu0 %vm303_vm0, %v2950_v45 }
 0x11f   : > { %658 = vmatpush.msrb.mxu2 %v2319_v61 }
 0x126   : > { %2368 = vmatmul.msk.f32.vlgmr.msrb.gmra.mxu2 %vm303_vm0, %v2950_v45 }
 0x18b   : > { %v516_v63 = vpop.f32.mrf.mxu0  ;;  %v548_v0 = vpop.f32.mrf.mxu1 }
 0x18c   : > { %v549_v1 = vadd.f32 %v2592_v62, %v548_v0  ;;  %v517_v14 = vadd.f32 %v2591_v8, %v516_v63  ;;  %v2341_v8 = vld [vmem:[%s3660_s3 + $0x1d0] sm:$0xff] }
 0x18e   : > { %2371 = vmatpush.xpose.msk.msra.mxu1 %vm706_vm2, %v549_v1 }
 0x190   : > { %v456_v3 = vpop.f32.mrf.mxu2  ;;  %v496_v4 = vpop.f32.mrf.mxu3 }
 0x191   : > { %v457_v7 = vadd.f32 %v2593_v2, %v456_v3  ;;  %v497_v21 = vadd.f32 %v2594_v15, %v496_v4 }
 0x193   : > { %v608_v9 = vpop.f32.mrf.mxu0  ;;  %v640_v10 = vpop.f32.mrf.mxu1  ;;  %2372 = vmatmul.msk.f32.vlgmr.msra.gmra.mxu1 %vm706_vm2, %v457_v7  ;;  %v2338_v7 = vld [vmem:[%s3660_s3 + $0x1b8] sm:$0xff] }
 0x194   : > { %v609_v11 = vadd.f32 %v2595_v5, %v608_v9  ;;  %v641_v12 = vadd.f32 %v2596_v6, %v640_v10  ;;  %v2342_v5 = vld [vmem:[%s3660_s3 + $0x1d8] sm:$0xff]  ;;  %v2345_v9 = vld [vmem:[%s3660_s3 + $0x1f0] sm:$0xff] }
 0x195   : > { %v2346_v6 = vld [vmem:[%s3660_s3 + $0x1f8] sm:$0xff] }
 0x196   : > { %2377 = vmatpush.xpose.msk.msra.mxu0 %vm706_vm2, %v609_v11  ;;  %925 = vmatpush.msrb.mxu1 %v641_v12  ;;  %v2334_v10 = vld [vmem:[%s3660_s3 + $0x198] sm:$0xff]  ;;  %v2337_v12 = vld [vmem:[%s3660_s3 + $0x1b0] sm:$0xff] }
 0x198   : > { %v476_v16 = vpop.f32.mrf.mxu2  ;;  %v588_v17 = vpop.f32.mrf.mxu3  ;;  %2383 = vmatpush.xpose.msk.msra.mxu1 %vm706_vm2, %v2334_v10 }
 0x199   : > { %v589_v19 = vadd.f32 %v2598_v13, %v588_v17  ;;  %2378 = vmatmul.msk.f32.vlgmr.msra.gmra.mxu0 %vm706_vm2, %v517_v14  ;;  %v477_v30 = vadd.f32 %v2597_v25, %v476_v16  ;;  %v2340_v17 = vld [vmem:[%s3660_s3 + $0x1c8] sm:$0xff] }
 0x19b   : > { %v700_v20 = vpop.f32.mrf.mxu0  ;;  %2375 = vmatpush.xpose.msk.msrb.mxu3 %vm706_vm2, %v589_v19 }
 0x19c   : > { %v701_v22 = vadd.f32 %v2599_v18, %v700_v20  ;;  %v2344_v18 = vld [vmem:[%s3660_s3 + $0x1e8] sm:$0xff] }
 0x19e   : > { %994 = vmatpush.msrb.mxu0 %v701_v22  ;;  %2376 = vmatmul.msk.f32.vlgmr.msrb.gmra.mxu3 %vm706_vm2, %v497_v21 }
 0x1a0   : > { %v680_v27 = vpop.f32.mrf.mxu3  ;;  %2398 = vmatpush.xpose.msk.msra.mxu0 %vm706_vm2, %v2346_v6 }
 0x1a1   : > { %v568_v26 = vpop.f32.mrf.mxu2  ;;  %v681_v29 = vadd.f32 %v2601_v24, %v680_v27 }
 0x1a2   : > { %v569_v28 = vadd.f32 %v2600_v23, %v568_v26  ;;  %v2339_v23 = vld [vmem:[%s3660_s3 + $0x1c0] sm:$0xff] }
 0x1a3   : > { %971 = vmatpush.msra.mxu3 %v681_v29 }
 0x1a4   : > { %2373 = vmatpush.xpose.msk.msra.mxu2 %vm706_vm2, %v569_v28  ;;  %2399 = vmatpush.xpose.msk.msra.mxu0 %vm706_vm2, %v2345_v9 }
 0x1a5   : > { %2393 = vmatpush.xpose.msk.msrb.mxu3 %vm706_vm2, %v2342_v5  ;;  %v2331_v5 = vld [vmem:[%s3660_s3 + $0x180] sm:$0xff] }
 0x1a7   : > { %2374 = vmatmul.msk.f32.vlgmr.msra.gmra.mxu2 %vm706_vm2, %v477_v30 }
 0x1a8   : > { %2400 = vmatpush.xpose.msk.msra.mxu0 %vm706_vm2, %v2344_v18 }
 0x1a9   : > { %v660_v32 = vpop.f32.mrf.mxu2  ;;  %2394 = vmatpush.xpose.msk.msrb.mxu3 %vm706_vm2, %v2341_v8 }
 0x1aa   : > { %v661_v33 = vadd.f32 %v2602_v31, %v660_v32 }
 0x1ac   : > { %948 = vmatpush.msrb.mxu2 %v661_v33 }
 0x1ad   : > { %2395 = vmatpush.xpose.msk.msrb.mxu3 %vm706_vm2, %v2340_v17 }
 0x1ae   : > { %2388 = vmatpush.xpose.msk.msra.mxu2 %vm706_vm2, %v2338_v7 }
 0x1b1   : > { %2396 = vmatpush.xpose.msk.msrb.mxu3 %vm706_vm2, %v2339_v23 }
 0x1b2   : > { %2389 = vmatpush.xpose.msk.msra.mxu2 %vm706_vm2, %v2337_v12 }
 0x210   : > { %v730_v41 = vpop.f32.mrf.mxu1 }
 0x211   : > { %v731_v42 = vadd.f32 %v3073_v34, %v730_v41 }
 0x213   : > { %v811_v47 = vsel %vm706_vm2, %v731_v42, -inf }
 0x216   : > { %v808_v35 = vpop.f32.mrf.mxu0 }
 0x217   : > { %v809_v36 = vadd.f32 %v3073_v34, %v808_v35 }
 0x219   : > { %v820_v37 = vsel %vm706_vm2, %v809_v36, -inf }
 0x21a   : > { %821 = vmax.xlane.f32.xlu2 %v820_v37 }
 0x221   : > { %v782_v38 = vpop.f32.mrf.mxu3 }
 0x222   : > { %v783_v39 = vadd.f32 %v3073_v34, %v782_v38 }
 0x224   : > { %v817_v40 = vsel %vm706_vm2, %v783_v39, -inf }
 0x225   : > { %818 = vmax.xlane.f32.xlu1 %v817_v40 }
 0x22a   : > { %v756_v43 = vpop.f32.mrf.mxu2 }
 0x22b   : > { %v757_v44 = vadd.f32 %v3073_v34, %v756_v43 }
 0x22d   : > { %v814_v46 = vsel %vm706_vm2, %v757_v44, -inf  ;;  %812 = vmax.xlane.f32.xlu1 %v811_v47 }
 0x22e   : > { %815 = vmax.xlane.f32.xlu0 %v814_v46 }
 0x28d   : > { %v822_v48 = vpop.xlane.xlu2 %821 }
 0x28e   : > { %v826_v51 = vsub.f32 %v809_v36, %v822_v48 }
 0x290   : > { %v833_v53 = vmul.f32 1.442695, %v826_v51 }
 0x298   : > { %v819_v49 = vpop.xlane.xlu1 %818 }
 0x299   : > { %v825_v50 = vsub.f32 %v783_v39, %v819_v49 }
 0x29b   : > { %v831_v52 = vmul.f32 1.442695, %v825_v50 }
 0x29d   : > { %2629 = vpow2.f32 %v831_v52 }
 0x29e   : > { %2631 = vpow2.f32 %v833_v53 }
 0x2a0   : > { %v813_v55 = vpop.xlane.xlu1 %812 }
 0x2a1   : > { %v816_v54 = vpop.xlane.xlu0 %815  ;;  %v823_v59 = vsub.f32 %v731_v42, %v813_v55 }
 0x2a2   : > { %v824_v56 = vsub.f32 %v757_v44, %v816_v54 }
 0x2a3   : > { %v3083_v57 = vpop.eup %2629  ;;  %v827_v61 = vmul.f32 1.442695, %v823_v59 }
 0x2a4   : > { %v829_v58 = vmul.f32 1.442695, %v824_v56  ;;  %v841_v60 = vsel %vm706_vm2, %v3083_v57, 0.0  ;;  %v3087_v62 = vpop.eup %2631 }
 0x2a5   : > { %842 = vadd.xlane.f32.xlu1 %v841_v60  ;;  %v844_v1 = vsel %vm706_vm2, %v3087_v62, 0.0 }
 0x2a6   : > { %2633 = vpow2.f32 %v829_v58 }
 0x2a7   : > { %2635 = vpow2.f32 %v827_v61 }
 0x2ac   : > { %v3089_v63 = vpop.eup %2633 }
 0x2ad   : > { %v838_v0 = vsel %vm706_vm2, %v3089_v63, 0.0  ;;  %845 = vadd.xlane.f32.xlu1 %v844_v1  ;;  %v3095_v2 = vpop.eup %2635 }
 0x2ae   : > { %839 = vadd.xlane.f32.xlu2 %v838_v0  ;;  %v835_v3 = vsel %vm706_vm2, %v3095_v2, 0.0 }
 0x2b6   : > { %836 = vadd.xlane.f32.xlu2 %v835_v3  ;;  %v2336_v3 = vld [vmem:[%s3660_s3 + $0x1a8] sm:$0xff] }
 0x2b7   : > { %2390 = vmatpush.xpose.msk.msra.mxu2 %vm706_vm2, %v2336_v3 }
 0x318   : > { %v843_v4 = vpop.xlane.xlu1 %842 }
 0x319   : > { %2637 = vrcp.f32 %v843_v4  ;;  %v888_v19 = vand.u32 2147483648, %v843_v4  ;;  %v886_v21 = vand.u32 2147483647, %v843_v4  ;;  %vm882_vm4 = vweird.f32 %v843_v4 }
 0x31b   : > { %v889_v25 = vor.u32 1.1754944e-38, %v888_v19  ;;  %vm887_vm6 = vcmp.eq.f32.partialorder %v886_v21, 8.507059e+37  ;;  %v2603_v19 = vld [vmem:[%s3663_s6] ss:$0 sm:$0xff] }
 0x31f   : > { %v2638_v11 = vpop.eup %2637 }
 0x320   : > { %v878_v13 = vmul.f32 %v2638_v11, %v843_v4  ;;  %v846_v15 = vpop.xlane.xlu1 %845  ;;  %vm883_vm3 = vweird.f32 %v2638_v11  ;;  %v2335_v4 = vld [vmem:[%s3660_s3 + $0x1a0] sm:$0xff] }
 0x321   : > { %v840_v14 = vpop.xlane.xlu2 %839  ;;  %vm884_vm5 = vmor %vm882_vm4, %vm883_vm3  ;;  %v903_v39 = vand.u32 2147483648, %v846_v15  ;;  %v901_v41 = vand.u32 2147483647, %v846_v15  ;;  %vm897_vm11 = vweird.f32 %v846_v15  ;;  %2391 = vmatpush.xpose.msk.msra.mxu2 %vm706_vm2, %v2335_v4 }
 0x322   : > { %2639 = vrcp.f32 %v840_v14  ;;  %v879_v16 = vsub.f32 1.0, %v878_v13  ;;  %v873_v33 = vand.u32 2147483648, %v840_v14  ;;  %v871_v38 = vand.u32 2147483647, %v840_v14 }
 0x323   : > { %2641 = vrcp.f32 %v846_v15  ;;  %vm867_vm9 = vweird.f32 %v840_v14  ;;  %v904_v48 = vor.u32 1.1754944e-38, %v903_v39  ;;  %vm902_vm14 = vcmp.eq.f32.partialorder %v901_v41, 8.507059e+37  ;;  %v409_v39 = vld [vmem:[%s3662_s5 + $0x8] sm:$0xff]  ;;  %v2358_v41 = vld [vmem:[%s3662_s5 + $0x38] sm:$0xff] }
 0x324   : > { %v880_v20 = vmul.f32 %v2638_v11, %v879_v16  ;;  %v874_v44 = vor.u32 1.1754944e-38, %v873_v33  ;;  %vm872_vm12 = vcmp.eq.f32.partialorder %v871_v38, 8.507059e+37  ;;  %v410_v38 = vld [vmem:[%s3662_s5 + $0x10] sm:$0xff] }
 0x326   : > { %v881_v22 = vadd.f32 %v2638_v11, %v880_v20 }
 0x328   : > { %v2640_v24 = vpop.eup %2639  ;;  %v885_v27 = vsel %vm884_vm5, %v2638_v11, %v881_v22 }
 0x329   : > { %v2642_v26 = vpop.eup %2641  ;;  %v863_v28 = vmul.f32 %v2640_v24, %v840_v14  ;;  %v837_v29 = vpop.xlane.xlu2 %836  ;;  %v890_v30 = vsel %vm887_vm6, %v889_v25, %v885_v27  ;;  %vm868_vm7 = vweird.f32 %v2640_v24  ;;  %v2737_v25 = vmov 32.0  }
 0x32a   : > { %v893_v31 = vmul.f32 %v2642_v26, %v846_v15  ;;  %2643 = vrcp.f32 %v837_v29  ;;  %v891_v36 = vmul.f32 %v3083_v57, %v890_v30  ;;  %vm898_vm8 = vweird.f32 %v2642_v26  ;;  %vm869_vm10 = vmor %vm867_vm9, %vm868_vm7 }
 0x32b   : > { %v864_v32 = vsub.f32 1.0, %v863_v28  ;;  %vm899_vm13 = vmor %vm897_vm11, %vm898_vm8  ;;  %v858_v55 = vand.u32 2147483648, %v837_v29  ;;  %v856_v58 = vand.u32 2147483647, %v837_v29  ;;  %vm852_vm1 = vweird.f32 %v837_v29 }
 0x32c   : > { %v894_v35 = vsub.f32 1.0, %v893_v31  ;;  %2381 = vmatmul.msk.f32.vlgmr.msra.gmra.mxu3 %vm706_vm2, %v891_v36  ;;  %2645 = vrcp.f32 %v2737_v25  ;;  %vm1208_vm6 = vcmask 523264   ;;  %v2417_v25 = vld [vmem:[%s3660_s3 + $0x240] sm:$0xff] }
 0x32d   : > { %v865_v37 = vmul.f32 %v2640_v24, %v864_v32  ;;  %v859_v60 = vor.u32 1.1754944e-38, %v858_v55  ;;  %vm857_vm4 = vcmp.eq.f32.partialorder %v856_v58, 8.507059e+37 }
 0x32e   : > { %v895_v40 = vmul.f32 %v2642_v26, %v894_v35 }
 0x32f   : > { %v866_v42 = vadd.f32 %v2640_v24, %v865_v37  ;;  %v411_v37 = vld [vmem:[%s3662_s5 + $0x18] sm:$0xff] }
 0x330   : > { %v2644_v43 = vpop.eup %2643  ;;  %v896_v46 = vadd.f32 %v2642_v26, %v895_v40  ;;  %v408_v40 = vld [vmem:[%s3662_s5] sm:$0xff] }
 0x331   : > { %v870_v47 = vsel %vm869_vm10, %v2640_v24, %v866_v42  ;;  %v848_v49 = vmul.f32 %v2644_v43, %v837_v29  ;;  %vm853_vm15 = vweird.f32 %v2644_v43  ;;  %v2357_v42 = vld [vmem:[%s3662_s5 + $0x30] sm:$0xff] }
 0x332   : > { %v875_v50 = vsel %vm872_vm12, %v874_v44, %v870_v47  ;;  %v900_v51 = vsel %vm899_vm13, %v2642_v26, %v896_v46  ;;  %vm854_vm3 = vmor %vm852_vm1, %vm853_vm15  ;;  %v2646_v26 = vpop.eup %2645  ;;  %v2356_v47 = vld [vmem:[%s3662_s5 + $0x28] sm:$0xff] }
 0x333   : > { %v905_v52 = vsel %vm902_vm14, %v904_v48, %v900_v51  ;;  %v849_v53 = vsub.f32 1.0, %v848_v49  ;;  %v876_v54 = vmul.f32 %v3089_v63, %v875_v50  ;;  %v2343_v63 = vld [vmem:[%s3660_s3 + $0x1e0] sm:$0xff]  ;;  %v1153_v27 = vmul.f32 32.0, %v2646_v26 }
 0x334   : > { %v906_v56 = vmul.f32 %v3087_v62, %v905_v52  ;;  %v2333_v62 = vld [vmem:[%s3660_s3 + $0x190] sm:$0xff]  ;;  %2401 = vmatpush.xpose.msk.msra.mxu0 %vm706_vm2, %v2343_v63  ;;  %vm1157_vm5 = vweird.f32 %v2646_v26  ;;  %v2607_v63 = vld [vmem:[%s3663_s6 + $0x5] ss:$0 sm:$0xff] }
 0x335   : > { %v850_v57 = vmul.f32 %v2644_v43, %v849_v53  ;;  %2380 = vmatmul.msk.f32.vlgmr.msrb.gmra.mxu2 %vm706_vm2, %v876_v54  ;;  %2384 = vmatpush.xpose.msk.msra.mxu1 %vm706_vm2, %v2333_v62  ;;  %v1154_v28 = vsub.f32 1.0, %v1153_v27  ;;  %v2604_v54 = vld [vmem:[%s3663_s6 + $0x1] ss:$0 sm:$0xff]  ;;  %v2424_v27 = vld [vmem:[%s3660_s3 + $0x278] sm:$0xff] }
 0x336   : > { %2382 = vmatmul.msk.f32.vlgmr.msrb.gmra.mxu0 %vm706_vm2, %v906_v56  ;;  %2404 = vmatpush.xpose.msk.msrb.mxu2 %vm1208_vm6, %v2358_v41  ;;  %v2450_v41 = vld [vmem:[%s3660_s3 + $0x348] sm:$0xff] }
 0x337   : > { %v851_v59 = vadd.f32 %v2644_v43, %v850_v57  ;;  %v1155_v29 = vmul.f32 %v2646_v26, %v1154_v28  ;;  %v2605_v57 = vld [vmem:[%s3663_s6 + $0x2] ss:$0 sm:$0xff]  ;;  %v2428_v28 = vld [vmem:[%s3660_s3 + $0x298] sm:$0xff] }
 0x339   : > { %v855_v61 = vsel %vm854_vm3, %v2644_v43, %v851_v59  ;;  %v1156_v30 = vadd.f32 %v2646_v26, %v1155_v29  ;;  %v2432_v29 = vld [vmem:[%s3660_s3 + $0x2b8] sm:$0xff] }
 0x33a   : > { %v860_v0 = vsel %vm857_vm4, %v859_v60, %v855_v61  ;;  %2405 = vmatpush.xpose.msk.msrb.mxu2 %vm1208_vm6, %v2357_v42  ;;  %v2355_v60 = vld [vmem:[%s3662_s5 + $0x20] sm:$0xff] }
 0x33b   : > { %v861_v1 = vmul.f32 %v3095_v2, %v860_v0  ;;  %v2332_v2 = vld [vmem:[%s3660_s3 + $0x188] sm:$0xff]  ;;  %v3184_v31 = vsel %vm1157_vm5, %v2646_v26, %v1156_v30  ;;  %v2606_v61 = vld [vmem:[%s3663_s6 + $0x6] ss:$0 sm:$0xff]  ;;  %v2452_v30 = vld [vmem:[%s3660_s3 + $0x358] sm:$0xff] }
 0x33c   : > { %2385 = vmatpush.xpose.msk.msra.mxu1 %vm706_vm2, %v2332_v2  ;;  %v2433_v26 = vld [vmem:[%s3660_s3 + $0x2c0] sm:$0xff] }
 0x33d   : > { %2379 = vmatmul.msk.f32.vlgmr.msrb.gmra.mxu1 %vm706_vm2, %v861_v1 }
 0x33e   : > { %2406 = vmatpush.xpose.msk.msrb.mxu2 %vm1208_vm6, %v2356_v47  ;;  %v2449_v47 = vld [vmem:[%s3660_s3 + $0x340] sm:$0xff] }
 0x340   : > { %2386 = vmatpush.xpose.msk.msra.mxu1 %vm706_vm2, %v2331_v5 }
 0x342   : > { %2407 = vmatpush.xpose.msk.msrb.mxu2 %vm1208_vm6, %v2355_v60  ;;  %v2440_v60 = vld [vmem:[%s3660_s3 + $0x2f8] sm:$0xff] }
 0x344   : > { %1198 = vmatpush.msrb.mxu1 %v411_v37 }
 0x346   : > { %1199 = vmatpush.msrb.mxu1 %v410_v38  ;;  %v2422_v38 = vld [vmem:[%s3660_s3 + $0x268] sm:$0xff] }
 0x348   : > { %1200 = vmatpush.msrb.mxu1 %v409_v39  ;;  %v2426_v39 = vld [vmem:[%s3660_s3 + $0x288] sm:$0xff] }
 0x34a   : > { %1201 = vmatpush.msrb.mxu1 %v408_v40  ;;  %v2430_v40 = vld [vmem:[%s3660_s3 + $0x2a8] sm:$0xff] }
 0x3af   : > { %v973_v6 = vpop.f32.mrf.mxu3 }
 0x3b0   : > { %2397 = vmatmul.msk.f32.vlgmr.msrb.gmra.mxu3 %vm706_vm2, %v973_v6 }
 0x3b3   : > { %v996_v7 = vpop.f32.mrf.mxu0 }
 0x3b4   : > { %2402 = vmatmul.msk.f32.vlgmr.msra.gmra.mxu0 %vm706_vm2, %v996_v7 }
 0x3b8   : > { %v950_v8 = vpop.f32.mrf.mxu2 }
 0x3b9   : > { %2392 = vmatmul.msk.f32.vlgmr.msra.gmra.mxu2 %vm706_vm2, %v950_v8 }
 0x3ba   : > { %v927_v9 = vpop.f32.mrf.mxu1 }
 0x3bb   : > { %2387 = vmatmul.msk.f32.vlgmr.msra.gmra.mxu1 %vm706_vm2, %v927_v9 }
 0x431   : > { %v1136_v15 = vpop.f32.mrf.mxu0 }
 0x432   : > { %v1144_v20 = vsel %vm303_vm0, %v1136_v15, 0.0  ;;  %v2411_v15 = vld [vmem:[%s3660_s3 + $0x210] sm:$0xff] }
 0x433   : > { %v1101_v11 = vpop.f32.mrf.mxu3 }
 0x434   : > { %v1142_v17 = vsel %vm303_vm0, %v1101_v11, 0.0  ;;  %v2412_v11 = vld [vmem:[%s3660_s3 + $0x218] sm:$0xff] }
 0x435   : > { %1398 = vmatpush.msra.mxu3 %v2412_v11  ;;  %v2453_v11 = vld [vmem:[%s3660_s3 + $0x360] sm:$0xff] }
 0x437   : > { %1399 = vmatpush.msra.mxu3 %v2411_v15  ;;  %v2614_v15 = vld [vmem:[%s3661_s4 + $0x10] ss:$0 sm:$0xff] }
 0x438   : > { %v1031_v10 = vpop.f32.mrf.mxu1 }
 0x439   : > { %v1139_v13 = vsel %vm303_vm0, %v1031_v10, 0.0 }
 0x43c   : > { %v1066_v12 = vpop.f32.mrf.mxu2 }
 0x43d   : > { %v1140_v14 = vsel %vm303_vm0, %v1066_v12, 0.0  ;;  %v2416_v12 = vld [vmem:[%s3660_s3 + $0x238] sm:$0xff] }
 0x43e   : > { %v1141_v16 = vadd.f32 %v1140_v14, %v1139_v13  ;;  %v2420_v13 = vld [vmem:[%s3660_s3 + $0x258] sm:$0xff]  ;;  %1418 = vmatpush.msrb.mxu0 %v2416_v12 }
 0x43f   : > { %v2436_v14 = vld [vmem:[%s3660_s3 + $0x2d8] sm:$0xff]  ;;  %1438 = vmatpush.msra.mxu1 %v2420_v13 }
 0x440   : > { %v1143_v18 = vadd.f32 %v1142_v17, %v1141_v16  ;;  %1530 = vmatpush.msra.mxu2 %v2436_v14  ;;  %v2415_v16 = vld [vmem:[%s3660_s3 + $0x230] sm:$0xff] }
 0x441   : > { %v2419_v17 = vld [vmem:[%s3660_s3 + $0x250] sm:$0xff]  ;;  %1419 = vmatpush.msrb.mxu0 %v2415_v16 }
 0x442   : > { %v1145_v21 = vadd.f32 %v1144_v20, %v1143_v18  ;;  %v2435_v18 = vld [vmem:[%s3660_s3 + $0x2d0] sm:$0xff]  ;;  %1439 = vmatpush.msra.mxu1 %v2419_v17  ;;  %v2414_v20 = vld [vmem:[%s3660_s3 + $0x228] sm:$0xff] }
 0x443   : > { %1531 = vmatpush.msra.mxu2 %v2435_v18  ;;  %1420 = vmatpush.msrb.mxu0 %v2414_v20  ;;  %v2613_v14 = vld [vmem:[%s3661_s4 + $0x12] ss:$0 sm:$0xff]  ;;  %v2615_v17 = vld [vmem:[%s3661_s4 + $0x11] ss:$0 sm:$0xff]  ;;  %v2611_v18 = vld [vmem:[%s3661_s4 + $0xe] ss:$0 sm:$0xff] }
 0x444   : > { %v1147_v22 = vadd.f32 %v2603_v19, %v1145_v21  ;;  %v2410_v19 = vld [vmem:[%s3660_s3 + $0x208] sm:$0xff] }
 0x445   : > { %v2418_v21 = vld [vmem:[%s3660_s3 + $0x248] sm:$0xff]  ;;  %1400 = vmatpush.msra.mxu3 %v2410_v19 }
 0x446   : > { %v1148_v23 = vadd.f32 %v1147_v22, %v2950_v45  ;;  %v2434_v22 = vld [vmem:[%s3660_s3 + $0x2c8] sm:$0xff]  ;;  %1440 = vmatpush.msra.mxu1 %v2418_v21 }
 0x447   : > { %1532 = vmatpush.msra.mxu2 %v2434_v22  ;;  %v2612_v20 = vld [vmem:[%s3661_s4 + $0xc] ss:$0 sm:$0xff] }
 0x448   : > { %v1149_v24 = vsel %vm303_vm0, %v1148_v23, 0.0  ;;  %1441 = vmatpush.msra.mxu1 %v2417_v25 }
 0x449   : > { %1150 = vadd.xlane.f32.xlu2 %v1149_v24  ;;  %v2413_v24 = vld [vmem:[%s3660_s3 + $0x220] sm:$0xff]  ;;  %1533 = vmatpush.msra.mxu2 %v2433_v26 }
 0x44a   : > { %1421 = vmatpush.msrb.mxu0 %v2413_v24 }
 0x44c   : > { %1490 = vmatpush.msra.mxu0 %v2428_v28 }
 0x4bc   : > { %v1151_v32 = vpop.xlane.xlu2 %1150 }
 0x4bd   : > { %v1159_v33 = vmul.f32 %v3184_v31, %v1151_v32  ;;  %v2423_v32 = vld [vmem:[%s3660_s3 + $0x270] sm:$0xff] }
 0x4bf   : > { %v1160_v35 = vsub.f32 %v1148_v23, %v1159_v33  ;;  %v2409_v23 = vld [vmem:[%s3660_s3 + $0x200] sm:$0xff]  ;;  %v2427_v33 = vld [vmem:[%s3660_s3 + $0x290] sm:$0xff] }
 0x4c0   : > { %1401 = vmatpush.msra.mxu3 %v2409_v23  ;;  %1491 = vmatpush.msra.mxu0 %v2427_v33  ;;  %v2610_v23 = vld [vmem:[%s3661_s4 + $0xd] ss:$0 sm:$0xff] }
 0x4c1   : > { %v1161_v36 = vmul.f32 %v1160_v35, %v1160_v35 }
 0x4c2   : > { %1458 = vmatpush.msrb.mxu3 %v2424_v27  ;;  %1492 = vmatpush.msra.mxu0 %v2426_v39 }
 0x4c3   : > { %v1162_v45 = vsel %vm303_vm0, %v1161_v36, 0.0  ;;  %v2431_v36 = vld [vmem:[%s3660_s3 + $0x2b0] sm:$0xff] }
 0x4c4   : > { %1163 = vadd.xlane.f32.xlu1 %v1162_v45  ;;  %v2451_v45 = vld [vmem:[%s3660_s3 + $0x350] sm:$0xff]  ;;  %1459 = vmatpush.msrb.mxu3 %v2423_v32 }
 0x4c5   : > { %v2618_v32 = vld [vmem:[%s3661_s4 + $0x14] ss:$0 sm:$0xff] }
 0x4c6   : > { %1460 = vmatpush.msrb.mxu3 %v2422_v38 }
 0x537   : > { %v1164_v43 = vpop.xlane.xlu1 %1163 }
 0x538   : > { %v1165_v44 = vmul.f32 %v1164_v43, %v3184_v31  ;;  %v2421_v43 = vld [vmem:[%s3660_s3 + $0x260] sm:$0xff] }
 0x539   : > { %1461 = vmatpush.msrb.mxu3 %v2421_v43 }
 0x53a   : > { %v1166_v46 = vadd.f32 1e-05, %v1165_v44  ;;  %v2425_v44 = vld [vmem:[%s3660_s3 + $0x280] sm:$0xff] }
 0x53b   : > { %1493 = vmatpush.msra.mxu0 %v2425_v44 }
 0x53c   : > { %2647 = vrsqrt.f32 %v1166_v46  ;;  %vm1173_vm8 = vweird.f32 %v1166_v46 }
 0x542   : > { %v2648_v48 = vpop.eup %2647 }
 0x543   : > { %v1168_v49 = vmul.f32 %v2648_v48, %v1166_v46  ;;  %vm1174_vm7 = vweird.f32 %v2648_v48  ;;  %v2429_v46 = vld [vmem:[%s3660_s3 + $0x2a0] sm:$0xff] }
 0x544   : > { %vm1175_vm9 = vmor %vm1173_vm8, %vm1174_vm7 }
 0x545   : > { %v1169_v50 = vmul.f32 %v2648_v48, %v1168_v49 }
 0x547   : > { %v1170_v51 = vmul.f32 0.5, %v1169_v50 }
 0x549   : > { %v1171_v52 = vsub.f32 1.5, %v1170_v51 }
 0x54b   : > { %v1172_v53 = vmul.f32 %v2648_v48, %v1171_v52 }
 0x54d   : > { %v1176_v55 = vsel %vm1175_vm9, %v2648_v48, %v1172_v53 }
 0x54e   : > { %v1177_v56 = vmul.f32 %v1176_v55, %v1160_v35 }
 0x550   : > { %v1179_v58 = vmul.f32 %v2604_v54, %v1177_v56  ;;  %v2608_v54 = vld [vmem:[%s3663_s6 + $0x3] ss:$0 sm:$0xff]  ;;  %v2609_v56 = vld [vmem:[%s3663_s6 + $0x4] ss:$0 sm:$0xff] }
 0x552   : > { %v1181_v59 = vadd.f32 %v2605_v57, %v1179_v58 }
 0x554   : > { %2403 = vmatmul.msk.f32.vlgmr.msrb.gmra.mxu1 %vm303_vm0, %v1181_v59 }
 0x555   : > { %1510 = vmatpush.msrb.mxu1 %v2432_v29  ;;  %v2617_v29 = vld [vmem:[%s3661_s4 + $0x16] ss:$0 sm:$0xff] }
 0x557   : > { %1511 = vmatpush.msrb.mxu1 %v2431_v36 }
 0x559   : > { %1512 = vmatpush.msrb.mxu1 %v2430_v40 }
 0x55b   : > { %1513 = vmatpush.msrb.mxu1 %v2429_v46 }
 0x5d1   : > { %v1203_v0 = vpop.f32.mrf.mxu1 }
 0x5d2   : > { %v1204_v1 = vadd.f32 %v2606_v61, %v1203_v0  ;;  %v2444_v61 = vld [vmem:[%s3660_s3 + $0x318] sm:$0xff] }
 0x5d3   : > { %v2448_v0 = vld [vmem:[%s3660_s3 + $0x338] sm:$0xff] }
 0x5d4   : > { %v1206_v62 = vmax.f32 %v1204_v1, 0.0  ;;  %v2439_v1 = vld [vmem:[%s3660_s3 + $0x2f0] sm:$0xff] }
 0x5d6   : > { %2408 = vmatmul.msk.f32.vlgmr.msrb.gmra.mxu2 %vm1208_vm6, %v1206_v62  ;;  %v2443_v62 = vld [vmem:[%s3660_s3 + $0x310] sm:$0xff] }
 0x5d7   : > { %1622 = vmatpush.msrb.mxu2 %v2452_v30 }
 0x5d9   : > { %1623 = vmatpush.msrb.mxu2 %v2451_v45 }
 0x5db   : > { %1624 = vmatpush.msrb.mxu2 %v2450_v41  ;;  %v2620_v41 = vld [vmem:[%s3661_s4 + $0x13] ss:$0 sm:$0xff] }
 0x5dd   : > { %1625 = vmatpush.msrb.mxu2 %v2449_v47  ;;  %v2621_v47 = vld [vmem:[%s3661_s4 + $0x17] ss:$0 sm:$0xff] }
 0x659   : > { %v1241_v3 = vpop.f32.mrf.mxu2 }
 0x65a   : > { %v1242_v2 = vadd.f32 %v2607_v63, %v1241_v3  ;;  %v2447_v63 = vld [vmem:[%s3660_s3 + $0x330] sm:$0xff]  ;;  %v2438_v3 = vld [vmem:[%s3660_s3 + $0x2e8] sm:$0xff] }
 0x65c   : > { %v1244_v4 = vadd.f32 %v1242_v2, %v1181_v59  ;;  %v2442_v2 = vld [vmem:[%s3660_s3 + $0x308] sm:$0xff] }
 0x65e   : > { %v1245_v5 = vsel %vm303_vm0, %v1244_v4, 0.0 }
 0x65f   : > { %1246 = vadd.xlane.f32.xlu2 %v1245_v5  ;;  %v2437_v5 = vld [vmem:[%s3660_s3 + $0x2e0] sm:$0xff] }
 0x6d2   : > { %v1247_v6 = vpop.xlane.xlu2 %1246 }
 0x6d3   : > { %v1248_v7 = vmul.f32 %v1247_v6, %v3184_v31  ;;  %v2441_v6 = vld [vmem:[%s3660_s3 + $0x300] sm:$0xff] }
 0x6d5   : > { %v3233_v8 = vsub.f32 %v1244_v4, %v1248_v7  ;;  %v2446_v4 = vld [vmem:[%s3660_s3 + $0x328] sm:$0xff]  ;;  %v2445_v7 = vld [vmem:[%s3660_s3 + $0x320] sm:$0xff] }
 0x6d7   : > { %v1250_v9 = vmul.f32 %v3233_v8, %v3233_v8 }
 0x6d9   : > { %v1251_v10 = vsel %vm303_vm0, %v1250_v9, 0.0  ;;  %v2455_v9 = vld [vmem:[%s3660_s3 + $0x370] sm:$0xff] }
 0x6da   : > { %1252 = vadd.xlane.f32.xlu1 %v1251_v10  ;;  %v2454_v10 = vld [vmem:[%s3660_s3 + $0x368] sm:$0xff] }
 0x74d   : > { %v1253_v35 = vpop.xlane.xlu1 %1252 }
 0x74e   : > { %v1254_v37 = vmul.f32 %v1253_v35, %v3184_v31  ;;  %v2619_v35 = vld [vmem:[%s3661_s4 + $0x15] ss:$0 sm:$0xff] }
 0x750   : > { %v1255_v42 = vadd.f32 1e-05, %v1254_v37 }
 0x752   : > { %2649 = vrsqrt.f32 %v1255_v42  ;;  %vm1262_vm11 = vweird.f32 %v1255_v42 }
 0x758   : > { %v2650_v48 = vpop.eup %2649 }
 0x759   : > { %v1257_v49 = vmul.f32 %v2650_v48, %v1255_v42  ;;  %vm1263_vm10 = vweird.f32 %v2650_v48  ;;  %v2616_v42 = vld [vmem:[%s3661_s4 + $0xf] ss:$0 sm:$0xff] }
 0x75a   : > { %vm1264_vm12 = vmor %vm1262_vm11, %vm1263_vm10 }
 0x75b   : > { %v1258_v50 = vmul.f32 %v2650_v48, %v1257_v49 }
 0x75d   : > { %v1259_v51 = vmul.f32 0.5, %v1258_v50 }
 0x75f   : > { %v1260_v52 = vsub.f32 1.5, %v1259_v51 }
 0x761   : > { %v1261_v53 = vmul.f32 %v2650_v48, %v1260_v52 }
 0x763   : > { %v1265_v55 = vsel %vm1264_vm12, %v2650_v48, %v1261_v53 }
 0x764   : > { %v1266_v57 = vmul.f32 %v1265_v55, %v3233_v8  ;;  %v2456_v8 = vld [vmem:[%s3660_s3 + $0x378] sm:$0xff] }
 0x766   : > { %v1268_v58 = vmul.f32 %v2608_v54, %v1266_v57 }
 0x768   : > { %v3342_v59 = vadd.f32 %v2609_v56, %v1268_v58 }
 0x76a   : > { %2493 = vmatmul.msk.f32.vlgmr.msra.gmra.mxu3 %vm303_vm0, %v3342_v59  ;;  %2494 = vmatmul.msk.f32.vlgmr.msrb.gmra.mxu0 %vm303_vm0, %v3342_v59 }
 0x76b   : > { %2495 = vmatmul.msk.f32.vlgmr.msra.gmra.mxu1 %vm303_vm0, %v3342_v59  ;;  %2499 = vmatmul.msk.f32.vlgmr.msra.gmra.mxu2 %vm303_vm0, %v3342_v59 }
 0x76c   : > { %1550 = vmatpush.msra.mxu3 %v2440_v60  ;;  %1582 = vmatpush.msrb.mxu0 %v2444_v61 }
 0x76d   : > { %1602 = vmatpush.msra.mxu1 %v2448_v0 }
 0x76e   : > { %1551 = vmatpush.msra.mxu3 %v2439_v1  ;;  %1583 = vmatpush.msrb.mxu0 %v2443_v62 }
 0x76f   : > { %1603 = vmatpush.msra.mxu1 %v2447_v63 }
 0x770   : > { %1552 = vmatpush.msra.mxu3 %v2438_v3  ;;  %1584 = vmatpush.msrb.mxu0 %v2442_v2 }
 0x771   : > { %1604 = vmatpush.msra.mxu1 %v2446_v4 }
 0x772   : > { %2496 = vmatmul.msk.f32.vlgmr.msrb.gmra.mxu3 %vm303_vm0, %v3342_v59  ;;  %2497 = vmatmul.msk.f32.vlgmr.msra.gmra.mxu0 %vm303_vm0, %v3342_v59 }
 0x773   : > { %2498 = vmatmul.msk.f32.vlgmr.msrb.gmra.mxu1 %vm303_vm0, %v3342_v59  ;;  %2503 = vmatmul.msk.f32.vlgmr.msrb.gmra.mxu2 %vm303_vm0, %v3342_v59 }
 0x774   : > { %1553 = vmatpush.msra.mxu3 %v2437_v5  ;;  %1585 = vmatpush.msrb.mxu0 %v2441_v6 }
 0x775   : > { %1605 = vmatpush.msra.mxu1 %v2445_v7 }
 0x776   : > { %1642 = vmatpush.msrb.mxu3 %v2456_v8 }
 0x778   : > { %1643 = vmatpush.msrb.mxu3 %v2455_v9 }
 0x77a   : > { %1644 = vmatpush.msrb.mxu3 %v2454_v10  ;;  %2501 = vmatmul.msk.f32.vlgmr.msrb.gmra.mxu0 %vm303_vm0, %v3342_v59 }
 0x77b   : > { %2500 = vmatmul.msk.f32.vlgmr.msra.gmra.mxu3 %vm303_vm0, %v3342_v59  ;;  %2502 = vmatmul.msk.f32.vlgmr.msra.gmra.mxu1 %vm303_vm0, %v3342_v59 }
 0x77c   : > { %1645 = vmatpush.msrb.mxu3 %v2453_v11 }
 0x783   : > { %2504 = vmatmul.msk.f32.vlgmr.msrb.gmra.mxu3 %vm303_vm0, %v3342_v59 }
 0x7e7   : > { %v1423_v12 = vpop.f32.mrf.mxu0 }
 0x7e8   : > { %v1443_v13 = vpop.f32.mrf.mxu1  ;;  %v1424_v30 = vadd.f32 %v2610_v23, %v1423_v12  ;;  %v2459_v23 = vld [vmem:[%s3660_s3 + $0x390] sm:$0xff] }
 0x7e9   : > { %v1444_v27 = vadd.f32 %v2611_v18, %v1443_v13 }
 0x7ed   : > { %v1403_v16 = vpop.f32.mrf.mxu3 }
 0x7ee   : > { %v1535_v19 = vpop.f32.mrf.mxu2  ;;  %v1404_v28 = vadd.f32 %v2612_v20, %v1403_v16  ;;  %v2460_v20 = vld [vmem:[%s3660_s3 + $0x398] sm:$0xff] }
 0x7ef   : > { %v1536_v21 = vadd.f32 %v2613_v14, %v1535_v19  ;;  %v1495_v22 = vpop.f32.mrf.mxu0  ;;  %v2468_v19 = vld [vmem:[%s3660_s3 + $0x3d8] sm:$0xff] }
 0x7f0   : > { %v1496_v24 = vadd.f32 %v2614_v15, %v1495_v22  ;;  %v1515_v25 = vpop.f32.mrf.mxu1  ;;  %v2467_v22 = vld [vmem:[%s3660_s3 + $0x3d0] sm:$0xff] }
 0x7f1   : > { %v1516_v26 = vadd.f32 %v2615_v17, %v1515_v25  ;;  %2509 = vmatpush.xpose.msk.msra.mxu2 %vm706_vm2, %v1536_v21  ;;  %v2464_v21 = vld [vmem:[%s3660_s3 + $0x3b8] sm:$0xff] }
 0x7f2   : > { %2505 = vmatpush.xpose.msk.msra.mxu0 %vm706_vm2, %v1496_v24  ;;  %v2463_v24 = vld [vmem:[%s3660_s3 + $0x3b0] sm:$0xff] }
 0x7f3   : > { %2507 = vmatpush.xpose.msk.msrb.mxu1 %vm706_vm2, %v1516_v26 }
 0x7f4   : > { %2510 = vmatmul.msk.f32.vlgmr.msra.gmra.mxu2 %vm706_vm2, %v1444_v27 }
 0x7f5   : > { %v1463_v33 = vpop.f32.mrf.mxu3  ;;  %2506 = vmatmul.msk.f32.vlgmr.msra.gmra.mxu0 %vm706_vm2, %v1404_v28 }
 0x7f6   : > { %v1627_v36 = vpop.f32.mrf.mxu2  ;;  %2508 = vmatmul.msk.f32.vlgmr.msrb.gmra.mxu1 %vm706_vm2, %v1424_v30  ;;  %v1464_v46 = vadd.f32 %v2616_v42, %v1463_v33  ;;  %v2458_v30 = vld [vmem:[%s3660_s3 + $0x388] sm:$0xff] }
 0x7f7   : > { %v1628_v45 = vadd.f32 %v2617_v29, %v1627_v36  ;;  %v1587_v37 = vpop.f32.mrf.mxu0  ;;  %v2466_v29 = vld [vmem:[%s3660_s3 + $0x3c8] sm:$0xff] }
 0x7f8   : > { %v1588_v38 = vadd.f32 %v2618_v32, %v1587_v37  ;;  %v1607_v39 = vpop.f32.mrf.mxu1  ;;  %v2462_v33 = vld [vmem:[%s3660_s3 + $0x3a8] sm:$0xff]  ;;  %v2465_v37 = vld [vmem:[%s3660_s3 + $0x3c0] sm:$0xff] }
 0x7f9   : > { %v1608_v40 = vadd.f32 %v2619_v35, %v1607_v39  ;;  %1914 = vmatpush.msrb.mxu2 %v1628_v45 }
 0x7fa   : > { %1868 = vmatpush.msrb.mxu0 %v1588_v38 }
 0x7fb   : > { %1891 = vmatpush.msra.mxu1 %v1608_v40  ;;  %2527 = vmatpush.xpose.msk.msra.mxu2 %vm706_vm2, %v2468_v19  ;;  %v2469_v19 = vld [vmem:[%s3660_s3 + $0x3e0] sm:$0xff] }
 0x7fc   : > { %2517 = vmatpush.xpose.msk.msra.mxu0 %vm706_vm2, %v2460_v20 }
 0x7fd   : > { %2522 = vmatpush.xpose.msk.msrb.mxu1 %vm706_vm2, %v2464_v21 }
 0x7fe   : > { %v1555_v43 = vpop.f32.mrf.mxu3 }
 0x7ff   : > { %v1556_v44 = vadd.f32 %v2620_v41, %v1555_v43  ;;  %2528 = vmatpush.xpose.msk.msra.mxu2 %vm706_vm2, %v2467_v22 }
 0x800   : > { %2518 = vmatpush.xpose.msk.msra.mxu0 %vm706_vm2, %v2459_v23 }
 0x801   : > { %2511 = vmatpush.xpose.msk.msra.mxu3 %vm706_vm2, %v1556_v44  ;;  %2523 = vmatpush.xpose.msk.msrb.mxu1 %vm706_vm2, %v2463_v24 }
 0x803   : > { %2529 = vmatpush.xpose.msk.msra.mxu2 %vm706_vm2, %v2466_v29 }
 0x804   : > { %2512 = vmatmul.msk.f32.vlgmr.msra.gmra.mxu3 %vm706_vm2, %v1464_v46  ;;  %2519 = vmatpush.xpose.msk.msra.mxu0 %vm706_vm2, %v2458_v30 }
 0x805   : > { %2524 = vmatpush.xpose.msk.msrb.mxu1 %vm706_vm2, %v2462_v33 }
 0x806   : > { %v1647_v48 = vpop.f32.mrf.mxu3 }
 0x807   : > { %v1648_v49 = vadd.f32 %v2621_v47, %v1647_v48  ;;  %2530 = vmatpush.xpose.msk.msra.mxu2 %vm706_vm2, %v2465_v37 }
 0x809   : > { %1937 = vmatpush.msrb.mxu3 %v1648_v49 }
 0x872   : > { %v1673_v56 = vpop.f32.mrf.mxu0 }
 0x873   : > { %v1699_v50 = vpop.f32.mrf.mxu1  ;;  %v1674_v57 = vadd.f32 %v3073_v34, %v1673_v56 }
 0x874   : > { %v1700_v51 = vadd.f32 %v3073_v34, %v1699_v50 }
 0x875   : > { %v1754_v58 = vsel %vm706_vm2, %v1674_v57, -inf }
 0x876   : > { %v1757_v52 = vsel %vm706_vm2, %v1700_v51, -inf }
 0x877   : > { %v1725_v53 = vpop.f32.mrf.mxu2  ;;  %1758 = vmax.xlane.f32.xlu0 %v1757_v52 }
 0x878   : > { %v1726_v54 = vadd.f32 %v3073_v34, %v1725_v53 }
 0x87a   : > { %v1760_v55 = vsel %vm706_vm2, %v1726_v54, -inf }
 0x87b   : > { %1761 = vmax.xlane.f32.xlu2 %v1760_v55 }
 0x883   : > { %1755 = vmax.xlane.f32.xlu2 %v1754_v58 }
 0x887   : > { %v1751_v60 = vpop.f32.mrf.mxu3 }
 0x888   : > { %v1752_v61 = vadd.f32 %v3073_v34, %v1751_v60 }
 0x88a   : > { %v1763_v0 = vsel %vm706_vm2, %v1752_v61, -inf }
 0x88b   : > { %1764 = vmax.xlane.f32.xlu1 %v1763_v0 }
 0x8ea   : > { %v1759_v1 = vpop.xlane.xlu0 %1758 }
 0x8eb   : > { %v1767_v3 = vsub.f32 %v1700_v51, %v1759_v1 }
 0x8ed   : > { %v1772_v4 = vmul.f32 1.442695, %v1767_v3 }
 0x8ee   : > { %v1762_v62 = vpop.xlane.xlu2 %1761 }
 0x8ef   : > { %v1768_v63 = vsub.f32 %v1726_v54, %v1762_v62 }
 0x8f1   : > { %v1774_v2 = vmul.f32 1.442695, %v1768_v63 }
 0x8f3   : > { %2651 = vpow2.f32 %v1774_v2 }
 0x8f4   : > { %2653 = vpow2.f32 %v1772_v4 }
 0x8f6   : > { %v1756_v5 = vpop.xlane.xlu2 %1755 }
 0x8f7   : > { %v1766_v6 = vsub.f32 %v1674_v57, %v1756_v5 }
 0x8f9   : > { %v3468_v7 = vpop.eup %2651  ;;  %v1770_v8 = vmul.f32 1.442695, %v1766_v6 }
 0x8fa   : > { %v1784_v9 = vsel %vm706_vm2, %v3468_v7, 0.0  ;;  %v3472_v11 = vpop.eup %2653 }
 0x8fb   : > { %2655 = vpow2.f32 %v1770_v8  ;;  %1785 = vadd.xlane.f32.xlu1 %v1784_v9  ;;  %v1781_v14 = vsel %vm706_vm2, %v3472_v11, 0.0 }
 0x8fe   : > { %v1765_v34 = vpop.xlane.xlu1 %1764 }
 0x8ff   : > { %v1769_v10 = vsub.f32 %v1752_v61, %v1765_v34 }
 0x901   : > { %v1776_v12 = vmul.f32 1.442695, %v1769_v10  ;;  %v3474_v13 = vpop.eup %2655 }
 0x902   : > { %v1778_v15 = vsel %vm706_vm2, %v3474_v13, 0.0 }
 0x903   : > { %2657 = vpow2.f32 %v1776_v12  ;;  %1782 = vadd.xlane.f32.xlu1 %v1781_v14  ;;  %1779 = vadd.xlane.f32.xlu0 %v1778_v15 }
 0x909   : > { %v3480_v16 = vpop.eup %2657 }
 0x90a   : > { %v1787_v17 = vsel %vm706_vm2, %v3480_v16, 0.0 }
 0x90b   : > { %1788 = vadd.xlane.f32.xlu2 %v1787_v17  ;;  %v2472_v17 = vld [vmem:[%s3660_s3 + $0x3f8] sm:$0xff] }
 0x90c   : > { %2532 = vmatpush.xpose.msk.msra.mxu3 %vm706_vm2, %v2472_v17 }
 0x96e   : > { %v1786_v18 = vpop.xlane.xlu1 %1785 }
 0x96f   : > { %2659 = vrcp.f32 %v1786_v18  ;;  %v1831_v35 = vand.u32 2147483648, %v1786_v18  ;;  %v1829_v45 = vand.u32 2147483647, %v1786_v18  ;;  %vm1825_vm14 = vweird.f32 %v1786_v18 }
 0x971   : > { %v1832_v40 = vor.u32 1.1754944e-38, %v1831_v35  ;;  %vm1830_vm1 = vcmp.eq.f32.partialorder %v1829_v45, 8.507059e+37  ;;  %v2622_v35 = vld [vmem:[%s3663_s6 + $0x7] ss:$0 sm:$0xff] }
 0x975   : > { %v2660_v25 = vpop.eup %2659 }
 0x976   : > { %v1821_v26 = vmul.f32 %v2660_v25, %v1786_v18  ;;  %v1783_v27 = vpop.xlane.xlu1 %1782  ;;  %v1780_v28 = vpop.xlane.xlu0 %1779  ;;  %vm1826_vm13 = vweird.f32 %v2660_v25  ;;  %v2470_v18 = vld [vmem:[%s3660_s3 + $0x3e8] sm:$0xff] }
 0x977   : > { %2661 = vrcp.f32 %v1783_v27  ;;  %vm1827_vm15 = vmor %vm1825_vm14, %vm1826_vm13  ;;  %v1816_v50 = vand.u32 2147483648, %v1783_v27  ;;  %v1814_v53 = vand.u32 2147483647, %v1783_v27  ;;  %v1801_v54 = vand.u32 2147483648, %v1780_v28 }
 0x978   : > { %v1822_v32 = vsub.f32 1.0, %v1821_v26  ;;  %2663 = vrcp.f32 %v1780_v28  ;;  %v1799_v56 = vand.u32 2147483647, %v1780_v28  ;;  %vm1810_vm5 = vweird.f32 %v1783_v27 }
 0x979   : > { %v1817_v60 = vor.u32 1.1754944e-38, %v1816_v50  ;;  %vm1795_vm8 = vweird.f32 %v1780_v28  ;;  %vm1815_vm9 = vcmp.eq.f32.partialorder %v1814_v53, 8.507059e+37  ;;  %v1802_v62 = vor.u32 1.1754944e-38, %v1801_v54  ;;  %v2491_v50 = vld [vmem:[%s3662_s5 + $0x70] sm:$0xff]  ;;  %v2490_v54 = vld [vmem:[%s3662_s5 + $0x68] sm:$0xff] }
 0x97a   : > { %v1823_v36 = vmul.f32 %v2660_v25, %v1822_v32  ;;  %vm1800_vm11 = vcmp.eq.f32.partialorder %v1799_v56, 8.507059e+37 }
 0x97c   : > { %v1824_v38 = vadd.f32 %v2660_v25, %v1823_v36 }
 0x97d   : > { %v2662_v39 = vpop.eup %2661 }
 0x97e   : > { %v1789_v41 = vpop.xlane.xlu2 %1788  ;;  %v2664_v42 = vpop.eup %2663  ;;  %v1828_v43 = vsel %vm1827_vm15, %v2660_v25, %v1824_v38  ;;  %v1806_v44 = vmul.f32 %v2662_v39, %v1783_v27  ;;  %vm1811_vm3 = vweird.f32 %v2662_v39 }
 0x97f   : > { %2665 = vrcp.f32 %v1789_v41  ;;  %v1833_v46 = vsel %vm1830_vm1, %v1832_v40, %v1828_v43  ;;  %v1791_v47 = vmul.f32 %v2664_v42, %v1780_v28  ;;  %vm1796_vm4 = vweird.f32 %v2664_v42  ;;  %vm1812_vm7 = vmor %vm1810_vm5, %vm1811_vm3 }
 0x980   : > { %v1807_v48 = vsub.f32 1.0, %v1806_v44  ;;  %v1834_v49 = vmul.f32 %v3468_v7, %v1833_v46  ;;  %vm1797_vm10 = vmor %vm1795_vm8, %vm1796_vm4  ;;  %v1846_v5 = vand.u32 2147483648, %v1789_v41  ;;  %v1844_v8 = vand.u32 2147483647, %v1789_v41  ;;  %v2488_v46 = vld [vmem:[%s3662_s5 + $0x58] sm:$0xff] }
 0x981   : > { %v1792_v51 = vsub.f32 1.0, %v1791_v47  ;;  %vm1840_vm13 = vweird.f32 %v1789_v41  ;;  %v2486_v47 = vld [vmem:[%s3662_s5 + $0x48] sm:$0xff] }
 0x982   : > { %v1808_v52 = vmul.f32 %v2662_v39, %v1807_v48  ;;  %2515 = vmatmul.msk.f32.vlgmr.msrb.gmra.mxu2 %vm706_vm2, %v1834_v49  ;;  %v1847_v10 = vor.u32 1.1754944e-38, %v1846_v5  ;;  %vm1845_vm15 = vcmp.eq.f32.partialorder %v1844_v8, 8.507059e+37  ;;  %v2485_v48 = vld [vmem:[%s3662_s5 + $0x40] sm:$0xff]  ;;  %v2492_v49 = vld [vmem:[%s3662_s5 + $0x78] sm:$0xff]  ;;  %v2625_v5 = vld [vmem:[%s3663_s6 + $0xd] ss:$0 sm:$0xff] }
 0x983   : > { %v1793_v55 = vmul.f32 %v2664_v42, %v1792_v51 }
 0x984   : > { %v1809_v58 = vadd.f32 %v2662_v39, %v1808_v52 }
 0x985   : > { %v2666_v57 = vpop.eup %2665  ;;  %v1794_v61 = vadd.f32 %v2664_v42, %v1793_v55 }
 0x986   : > { %v1836_v0 = vmul.f32 %v2666_v57, %v1789_v41  ;;  %v1813_v1 = vsel %vm1812_vm7, %v2662_v39, %v1809_v58  ;;  %vm1841_vm12 = vweird.f32 %v2666_v57 }
 0x987   : > { %v1818_v63 = vsel %vm1815_vm9, %v1817_v60, %v1813_v1  ;;  %v1798_v3 = vsel %vm1797_vm10, %v2664_v42, %v1794_v61  ;;  %vm1842_vm14 = vmor %vm1840_vm13, %vm1841_vm12 }
 0x988   : > { %v1837_v2 = vsub.f32 1.0, %v1836_v0  ;;  %v1803_v4 = vsel %vm1800_vm11, %v1802_v62, %v1798_v3  ;;  %v1819_v6 = vmul.f32 %v3472_v11, %v1818_v63  ;;  %v2457_v11 = vld [vmem:[%s3660_s3 + $0x380] sm:$0xff]  ;;  %v2623_v0 = vld [vmem:[%s3663_s6 + $0x8] ss:$0 sm:$0xff]  ;;  %v2624_v63 = vld [vmem:[%s3663_s6 + $0x9] ss:$0 sm:$0xff] }
 0x989   : > { %v1804_v9 = vmul.f32 %v3474_v13, %v1803_v4  ;;  %v2461_v13 = vld [vmem:[%s3660_s3 + $0x3a0] sm:$0xff]  ;;  %2520 = vmatpush.xpose.msk.msra.mxu0 %vm706_vm2, %v2457_v11 }
 0x98a   : > { %v1838_v7 = vmul.f32 %v2666_v57, %v1837_v2  ;;  %2514 = vmatmul.msk.f32.vlgmr.msra.gmra.mxu1 %vm706_vm2, %v1819_v6  ;;  %v2489_v4 = vld [vmem:[%s3662_s5 + $0x60] sm:$0xff] }
 0x98b   : > { %2513 = vmatmul.msk.f32.vlgmr.msrb.gmra.mxu0 %vm706_vm2, %v1804_v9  ;;  %2525 = vmatpush.xpose.msk.msrb.mxu1 %vm706_vm2, %v2461_v13  ;;  %v2626_v9 = vld [vmem:[%s3663_s6 + $0xc] ss:$0 sm:$0xff] }
 0x98c   : > { %v1839_v34 = vadd.f32 %v2666_v57, %v1838_v7 }
 0x98d   : > { %2134 = vmatpush.msrb.mxu0 %v2488_v46 }
 0x98e   : > { %v1843_v12 = vsel %vm1842_vm14, %v2666_v57, %v1839_v34 }
 0x98f   : > { %v1848_v14 = vsel %vm1845_vm15, %v1847_v10, %v1843_v12  ;;  %2538 = vmatpush.xpose.msk.msra.mxu1 %vm1208_vm6, %v2492_v49 }
 0x990   : > { %v1849_v15 = vmul.f32 %v3480_v16, %v1848_v14  ;;  %v2471_v16 = vld [vmem:[%s3660_s3 + $0x3f0] sm:$0xff] }
 0x991   : > { %2533 = vmatpush.xpose.msk.msra.mxu3 %vm706_vm2, %v2471_v16 }
 0x992   : > { %2516 = vmatmul.msk.f32.vlgmr.msrb.gmra.mxu3 %vm706_vm2, %v1849_v15 }
 0x993   : > { %2539 = vmatpush.xpose.msk.msra.mxu1 %vm1208_vm6, %v2491_v50 }
 0x995   : > { %2534 = vmatpush.xpose.msk.msra.mxu3 %vm706_vm2, %v2470_v18 }
 0x997   : > { %2540 = vmatpush.xpose.msk.msra.mxu1 %vm1208_vm6, %v2490_v54 }
 0x999   : > { %2535 = vmatpush.xpose.msk.msra.mxu3 %vm706_vm2, %v2469_v19 }
 0x99b   : > { %2541 = vmatpush.xpose.msk.msra.mxu1 %vm1208_vm6, %v2489_v4 }
 0xa05   : > { %v1916_v20 = vpop.f32.mrf.mxu2 }
 0xa06   : > { %2531 = vmatmul.msk.f32.vlgmr.msra.gmra.mxu2 %vm706_vm2, %v1916_v20 }
 0xa07   : > { %v1893_v21 = vpop.f32.mrf.mxu1 }
 0xa08   : > { %v1870_v22 = vpop.f32.mrf.mxu0  ;;  %2526 = vmatmul.msk.f32.vlgmr.msrb.gmra.mxu1 %vm706_vm2, %v1893_v21 }
 0xa09   : > { %2521 = vmatmul.msk.f32.vlgmr.msra.gmra.mxu0 %vm706_vm2, %v1870_v22 }
 0xa15   : > { %v1939_v23 = vpop.f32.mrf.mxu3 }
 0xa16   : > { %2536 = vmatmul.msk.f32.vlgmr.msra.gmra.mxu3 %vm706_vm2, %v1939_v23 }
 0xa85   : > { %v2009_v25 = vpop.f32.mrf.mxu1 }
 0xa86   : > { %v1974_v24 = vpop.f32.mrf.mxu0  ;;  %v2083_v28 = vsel %vm303_vm0, %v2009_v25, 0.0 }
 0xa87   : > { %v2082_v27 = vsel %vm303_vm0, %v1974_v24, 0.0 }
 0xa88   : > { %v2084_v30 = vadd.f32 %v2083_v28, %v2082_v27  ;;  %v2627_v27 = vld [vmem:[%s3663_s6 + $0xa] ss:$0 sm:$0xff] }
 0xa89   : > { %v2044_v26 = vpop.f32.mrf.mxu2 }
 0xa8a   : > { %v2085_v29 = vsel %vm303_vm0, %v2044_v26, 0.0 }
 0xa8b   : > { %v2086_v32 = vadd.f32 %v2085_v29, %v2084_v30  ;;  %v2628_v29 = vld [vmem:[%s3663_s6 + $0xb] ss:$0 sm:$0xff] }
 0xa99   : > { %v2079_v33 = vpop.f32.mrf.mxu3 }
 0xa9a   : > { %v2087_v36 = vsel %vm303_vm0, %v2079_v33, 0.0 }
 0xa9b   : > { %v2088_v45 = vadd.f32 %v2087_v36, %v2086_v32 }
 0xa9d   : > { %v2090_v37 = vadd.f32 %v2622_v35, %v2088_v45 }
 0xa9f   : > { %v2091_v38 = vadd.f32 %v2090_v37, %v3342_v59  ;;  %v2487_v59 = vld [vmem:[%s3662_s5 + $0x50] sm:$0xff] }
 0xaa0   : > { %2135 = vmatpush.msrb.mxu0 %v2487_v59 }
 0xaa1   : > { %v2092_v39 = vsel %vm303_vm0, %v2091_v38, 0.0 }
 0xaa2   : > { %2093 = vadd.xlane.f32.xlu2 %v2092_v39  ;;  %2136 = vmatpush.msrb.mxu0 %v2486_v47 }
 0xaa4   : > { %2137 = vmatpush.msrb.mxu0 %v2485_v48 }
 0xb15   : > { %v2094_v40 = vpop.xlane.xlu2 %2093 }
 0xb16   : > { %v2095_v41 = vmul.f32 %v2094_v40, %v3184_v31 }
 0xb18   : > { %v2096_v42 = vsub.f32 %v2091_v38, %v2095_v41 }
 0xb1a   : > { %v2097_v43 = vmul.f32 %v2096_v42, %v2096_v42 }
 0xb1c   : > { %v2098_v44 = vsel %vm303_vm0, %v2097_v43, 0.0 }
 0xb1d   : > { %2099 = vadd.xlane.f32.xlu0 %v2098_v44 }
 0xb90   : > { %v2100_v51 = vpop.xlane.xlu0 %2099 }
 0xb91   : > { %v2101_v52 = vmul.f32 %v2100_v51, %v3184_v31 }
 0xb93   : > { %v2102_v53 = vadd.f32 1e-05, %v2101_v52 }
 0xb95   : > { %2667 = vrsqrt.f32 %v2102_v53  ;;  %vm2109_vm1 = vweird.f32 %v2102_v53 }
 0xb9b   : > { %v2668_v55 = vpop.eup %2667 }
 0xb9c   : > { %v2104_v56 = vmul.f32 %v2668_v55, %v2102_v53  ;;  %vm2110_vm2 = vweird.f32 %v2668_v55 }
 0xb9d   : > { %vm2111_vm3 = vmor %vm2109_vm1, %vm2110_vm2 }
 0xb9e   : > { %v2105_v57 = vmul.f32 %v2668_v55, %v2104_v56 }
 0xba0   : > { %v2106_v58 = vmul.f32 0.5, %v2105_v57 }
 0xba2   : > { %v2107_v60 = vsub.f32 1.5, %v2106_v58 }
 0xba4   : > { %v2108_v61 = vmul.f32 %v2668_v55, %v2107_v60 }
 0xba6   : > { %v2112_v1 = vsel %vm2111_vm3, %v2668_v55, %v2108_v61 }
 0xba7   : > { %v2113_v62 = vmul.f32 %v2112_v1, %v2096_v42 }
 0xba9   : > { %v2115_v3 = vmul.f32 %v2623_v0, %v2113_v62 }
 0xbab   : > { %v2117_v2 = vadd.f32 %v2624_v63, %v2115_v3 }
 0xbad   : > { %2537 = vmatmul.msk.f32.vlgmr.msrb.gmra.mxu0 %vm303_vm0, %v2117_v2 }
 0xc2a   : > { %v2139_v6 = vpop.f32.mrf.mxu0 }
 0xc2b   : > { %v2140_v7 = vadd.f32 %v2625_v5, %v2139_v6 }
 0xc2d   : > { %v2142_v8 = vmax.f32 %v2140_v7, 0.0 }
 0xc2f   : > { %2542 = vmatmul.msk.f32.vlgmr.msra.gmra.mxu1 %vm1208_vm6, %v2142_v8 }
 0xcac   : > { %v2176_v34 = vpop.f32.mrf.mxu1 }
 0xcad   : > { %v2177_v10 = vadd.f32 %v2626_v9, %v2176_v34 }
 0xcaf   : > { %v2179_v12 = vadd.f32 %v2177_v10, %v2117_v2 }
 0xcb1   : > { %v2180_v14 = vsel %vm303_vm0, %v2179_v12, 0.0 }
 0xcb2   : > { %2181 = vadd.xlane.f32.xlu1 %v2180_v14 }
 0xd25   : > { %v2182_v15 = vpop.xlane.xlu1 %2181 }
 0xd26   : > { %v2183_v11 = vmul.f32 %v2182_v15, %v3184_v31 }
 0xd28   : > { %v2184_v13 = vsub.f32 %v2179_v12, %v2183_v11 }
 0xd2a   : > { %v2185_v17 = vmul.f32 %v2184_v13, %v2184_v13 }
 0xd2c   : > { %v2186_v16 = vsel %vm303_vm0, %v2185_v17, 0.0 }
 0xd2d   : > { %2187 = vadd.xlane.f32.xlu2 %v2186_v16 }
 0xda0   : > { %v2188_v18 = vpop.xlane.xlu2 %2187 }
 0xda1   : > { %v2189_v19 = vmul.f32 %v2188_v18, %v3184_v31 }
 0xda3   : > { %v2190_v20 = vadd.f32 1e-05, %v2189_v19 }
 0xda5   : > { %2669 = vrsqrt.f32 %v2190_v20  ;;  %vm2197_vm4 = vweird.f32 %v2190_v20 }
 0xdab   : > { %v2670_v21 = vpop.eup %2669 }
 0xdac   : > { %v2192_v22 = vmul.f32 %v2670_v21, %v2190_v20  ;;  %vm2198_vm6 = vweird.f32 %v2670_v21 }
 0xdad   : > { %vm2199_vm5 = vmor %vm2197_vm4, %vm2198_vm6 }
 0xdae   : > { %v2193_v23 = vmul.f32 %v2670_v21, %v2192_v22 }
 0xdb0   : > { %v2194_v24 = vmul.f32 0.5, %v2193_v23 }
 0xdb2   : > { %v2195_v25 = vsub.f32 1.5, %v2194_v24 }
 0xdb4   : > { %v2196_v26 = vmul.f32 %v2670_v21, %v2195_v25 }
 0xdb6   : > { %v2200_v31 = vsel %vm2199_vm5, %v2670_v21, %v2196_v26 }
 0xdb7   : > { %v2201_v28 = vmul.f32 %v2200_v31, %v2184_v13 }
 0xdb9   : > { %v2203_v30 = vmul.f32 %v2627_v27, %v2201_v28 }
 0xdbb   : > { %v2205_v32 = vadd.f32 %v2628_v29, %v2203_v30 }
 0xdbd   : > { %2206 = vst.msk [vmem:[%s280_s18] sm:$0xff] %vm303_vm0, %v2205_v32 }
 0xdbe   : > { %2698 = shalt.err (!%p2695_p3)
}
 0xdbf   : > { %2547 = dma.vmem_to_hbm [thread:$0]  (%p2816_p5), %s2221_s28, 128, %s2223_s19, %s2208_s17  }
 0xdc0 PF: > { %p2553_p4 = scmp.ge.s32.totalorder %s2733_s27, 2  ;;  %s2234_s21 = sand.u32 1, %s2721_s24  }
 0xdc1   : > { %s2235_s14 = scalar_lea.sflag [#allocation3], %s2234_s21 }
 0xdc2   : > { %p2550_p7 = pnand %p2553_p4, %p2820_p6 }
 0xdc4   : > { %p2551_p8 = pneg %p2550_p7 }
 0xdc6   : > { %2716 = dma.done.wait (%p2551_p8), %s2235_s14, 128  }
 0xdc7   : > { %2718 = vsyncadd (%p2551_p8), %s2235_s14, 4294967168  ;;  %p17_p9 = scmp.ge.s32.totalorder %s2803_s30, 4   ;;  %s3667_s24 = smov %s2725_s25 }
 0xdc8   : > { %s3668_s25 = smov %s2729_s26  ;;  %s3669_s26 = smov %s2814_s10 }
 0xdc9   : > { %s3670_s27 = smov %s2803_s30  ;;  %19 = sbr.rel (!%p17_p9) target bundleno = 3 (0x3), region = 101 }
 0xdce   :  { %2241 = vsyncpa [#allocation3], 1 }
 0xdcf   :  { %2243 = vsyncpa [#allocation3 + $0x1], 1 }

</bundles_post_ra>
